<compile_context>
chip_gen: v6e
topology: v6e:2x2x1
jax: 0.10.0
libtpu: 0.0.40
codegen_flags: <defaults>
</compile_context>

<pallas_src>
import functools

import jax
import jax.numpy as jnp
from jax import lax
from jax.experimental import pallas as pl
from jax.experimental.pallas import tpu as pltpu

LANE = 128          # Cout padded to a multiple of this (lane-dense stores).
CIN_ALIGN = 16      # Cin padded to a multiple of this (bf16-friendly tap slices).


def _conv_bn_relu_kernel(x_ref, w_ref, shift_ref, o_ref, *,
                         kh_sz, kw_sz, c_in_pad, stride,
                         tile_h, w_out, k_dim, relu):
    """One (batch, row-tile) step: fused im2col conv + folded-BN bias + ReLU.

    x_ref:     (1, Hp, Wp, Cin_pad)        bf16, padded NHWC image (whole image)
    w_ref:     (K = KH*KW*Cin_pad, C_PAD)  bf16, BN scale folded, Cout padded
    shift_ref: (1, C_PAD)                  f32, folded BN shift (bias)
    o_ref:     (1, tile_h, Wout, C_PAD)    bf16, lane-dense output row tile
    """
    ht = pl.program_id(1)
    row_off = ht * (tile_h * stride)
    tile_h_in = (tile_h - 1) * stride + kh_sz

    # Row window for this tile (dynamic start, static size) straight off the
    # bf16 VMEM block -> patches are built in bf16 from the first touch.
    x_rows = x_ref[0, pl.ds(row_off, tile_h_in), :, :]       # (tile_h_in, Wp, Cin_pad)

    # im2col: one aligned (tile_h, Wout, Cin_pad) slice per kernel tap,
    # lane-concatenated into (tile_h, Wout, K).
    taps = []
    for kh in range(kh_sz):
        for kw in range(kw_sz):
            taps.append(lax.slice(
                x_rows,
                (kh, kw, 0),
                (kh + (tile_h - 1) * stride + 1,
                 kw + (w_out - 1) * stride + 1,
                 c_in_pad),
                (stride, stride, 1)))
    patches = jnp.concatenate(taps, axis=-1)                  # bf16 (tile_h, Wout, K)

    # Flatten spatial dims -> one big-M MXU contraction; pad M to 8 sublanes.
    m = tile_h * w_out
    patches2d = patches.reshape(m, k_dim)
    m_pad = ((m + 7) // 8) * 8
    if m_pad != m:
        patches2d = jnp.concatenate(
            [patches2d, jnp.zeros((m_pad - m, k_dim), patches2d.dtype)], axis=0)

    acc = lax.dot_general(
        patches2d, w_ref[...],
        dimension_numbers=(((1,), (0,)), ((), ())),
        preferred_element_type=jnp.float32)                   # f32 (M_pad, C_PAD)

    out = acc + shift_ref[...]                                # folded-BN shift
    if relu:
        out = jnp.maximum(out, 0.0)
    if m_pad != m:
        out = out[:m]
    o_ref[0] = out.reshape(tile_h, w_out, -1).astype(o_ref.dtype)


def _pick_tile_h(h_out, w_out, k_dim, c_pad, budget_bytes=12 << 20):
    """Largest row tile whose per-tile working set fits the budget, preferring
    minimal padded rows and sublane-aligned M (tile_h*Wout % 8 == 0)."""
    def tile_bytes(th):
        m = th * w_out
        # bf16 patches + f32 acc + double-buffered bf16 output block.
        return m * k_dim * 2 + m * c_pad * 4 + 2 * m * c_pad * 2

    th = h_out
    while th > 1 and tile_bytes(th) > budget_bytes:
        th = (th + 1) // 2

    best, best_key = th, None
    for cand in range(th, max(th - 8, 0), -1):
        n_tiles = -(-h_out // cand)
        key = (n_tiles * cand,                       # total (incl. padded) rows
               0 if (cand * w_out) % 8 == 0 else 1,  # prefer aligned M
               -cand)                                # prefer bigger tile
        if best_key is None or key < best_key:
            best_key, best = key, cand
    return best


def conv2d_bn_relu(x_nchw, weight_oihw, bn_gamma, bn_beta, bn_mean, bn_var,
                   *, stride=1, padding=0, relu=True, eps=1e-5, tile_h=None):
    """Pallas implementation of Conv2d(..., bias=False) + BatchNorm2d(eval) + ReLU.

    x_nchw:      (N, Cin, H, W)
    weight_oihw: (Cout, Cin, KH, KW)  (PyTorch layout)
    returns:     (N, Cout, Hout, Wout) float32
    """
    n, c_in, h, w = x_nchw.shape
    c_out, _, kh_sz, kw_sz = weight_oihw.shape

    hp = h + 2 * padding
    wp = w + 2 * padding
    h_out = (hp - kh_sz) // stride + 1
    w_out = (wp - kw_sz) // stride + 1

    c_in_pad = ((c_in + CIN_ALIGN - 1) // CIN_ALIGN) * CIN_ALIGN
    c_pad = ((c_out + LANE - 1) // LANE) * LANE
    k_dim = kh_sz * kw_sz * c_in_pad

    if tile_h is None:
        tile_h = _pick_tile_h(h_out, w_out, k_dim, c_pad)
    tile_h = max(1, min(tile_h, h_out))
    n_tiles = -(-h_out // tile_h)
    h_out_pad = n_tiles * tile_h
    # Rows the last (possibly padded) tile reads; pad the image so it never OOBs.
    hp_needed = (h_out_pad - 1) * stride + kh_sz
    hp_total = max(hp, hp_needed)

    # NCHW -> NHWC in bf16, with spatial zero-padding, bottom overhang for the
    # padded last row tile, and Cin lane padding all fused into one XLA pass.
    x_nhwc = jnp.transpose(x_nchw, (0, 2, 3, 1)).astype(jnp.bfloat16)
    x_padded = jnp.pad(
        x_nhwc,
        ((0, 0),
         (padding, hp_total - h - padding),
         (padding, padding),
         (0, c_in_pad - c_in)))

    # Fold BN (inference form) into the conv weight + a per-channel shift.
    inv_std = lax.rsqrt(bn_var.astype(jnp.float32) + eps)
    scale = bn_gamma.astype(jnp.float32) * inv_std                     # (Cout,)
    shift = bn_beta.astype(jnp.float32) - bn_mean.astype(jnp.float32) * scale

    # OIHW -> (KH, KW, Cin, Cout), scale folded, Cin/Cout zero-padded, flattened
    # to (K, C_PAD) in the same (kh, kw, cin) order as the in-kernel im2col.
    w_hwio = jnp.transpose(weight_oihw, (2, 3, 1, 0)).astype(jnp.float32)
    w_scaled = w_hwio * scale[None, None, None, :]
    w_full = jnp.zeros((kh_sz, kw_sz, c_in_pad, c_pad), jnp.float32)
    w_full = w_full.at[:, :, :c_in, :c_out].set(w_scaled)
    w_pad = w_full.reshape(k_dim, c_pad).astype(jnp.bfloat16)          # bf16 MXU operand
    shift_pad = jnp.zeros((1, c_pad), jnp.float32).at[0, :c_out].set(shift)

    kernel = functools.partial(
        _conv_bn_relu_kernel,
        kh_sz=kh_sz, kw_sz=kw_sz, c_in_pad=c_in_pad, stride=stride,
        tile_h=tile_h, w_out=w_out, k_dim=k_dim, relu=relu)

    cost = pl.CostEstimate(
        flops=2 * n * h_out_pad * w_out * k_dim * c_pad,
        transcendentals=0,
        bytes_accessed=(int(x_padded.size) * 2 + int(w_pad.size) * 2
                        + n * h_out_pad * w_out * c_pad * 2))

    out_nhwc = pl.pallas_call(
        kernel,
        out_shape=jax.ShapeDtypeStruct((n, h_out_pad, w_out, c_pad), jnp.bfloat16),
        grid=(n, n_tiles),
        in_specs=[
            # Whole padded image per batch; block index is constant in the
            # row-tile axis so it is fetched once per image (default double
            # buffering already covers the b -> b+1 prefetch).
            pl.BlockSpec((1, hp_total, wp, c_in_pad), lambda b, t: (b, 0, 0, 0)),
            pl.BlockSpec((k_dim, c_pad), lambda b, t: (0, 0)),
            pl.BlockSpec((1, c_pad), lambda b, t: (0, 0)),
        ],
        out_specs=pl.BlockSpec((1, tile_h, w_out, c_pad),
                               lambda b, t: (b, t, 0, 0)),
        compiler_params=pltpu.CompilerParams(
            dimension_semantics=("parallel", "parallel"),
            vmem_limit_bytes=48 * 1024 * 1024),
        cost_estimate=cost,
    )(x_padded, w_pad, shift_pad)

    # Strip row/lane padding, cast back to f32, return NCHW (PyTorch layout).
    out = out_nhwc[:, :h_out, :, :c_out].astype(jnp.float32)
    return jnp.transpose(out, (0, 3, 1, 2))


def _reference(x_nchw, weight_oihw, bn_gamma, bn_beta, bn_mean, bn_var,
               *, stride, padding, relu, eps=1e-5):
    y = lax.conv_general_dilated(
        x_nchw.astype(jnp.float32), weight_oihw.astype(jnp.float32),
        window_strides=(stride, stride),
        padding=[(padding, padding), (padding, padding)],
        dimension_numbers=("NCHW", "OIHW", "NCHW"),
    )
    inv_std = 1.0 / jnp.sqrt(bn_var + eps)
    y = (y - bn_mean[None, :, None, None]) * (bn_gamma * inv_std)[None, :, None, None] \
        + bn_beta[None, :, None, None]
    if relu:
        y = jnp.maximum(y, 0.0)
    return y


def _check(x, weight, gamma, beta, mean, var, *, stride, padding, tile_h=None):
    out = conv2d_bn_relu(x, weight, gamma, beta, mean, var,
                         stride=stride, padding=padding, relu=True, tile_h=tile_h)
    out = jax.block_until_ready(out)
    ref = _reference(x, weight, gamma, beta, mean, var,
                     stride=stride, padding=padding, relu=True)
    assert out.shape == ref.shape, (out.shape, ref.shape)
    # bf16 activations / weights / output storage vs f32 reference.
    assert jnp.allclose(out, ref, rtol=5e-2, atol=5e-2), \
        f"max abs err {jnp.max(jnp.abs(out - ref))}"


if __name__ == "__main__":
    # Module config: Conv2d(in_channels=4, out_channels=8, kernel_size=3,
    #                       stride=1, relu=True, bn=True)  -> conv has no bias.
    N, C_IN, C_OUT, K = 2, 4, 8, 3

    key = jax.random.PRNGKey(0)
    kx1, kx2, kx3, kw, kg, kb, km, kv = jax.random.split(key, 8)

    # Deterministic xavier-uniform init (matches init_uniform(..., 'xavier')).
    fan_in, fan_out = C_IN * K * K, C_OUT * K * K
    bound = (6.0 / (fan_in + fan_out)) ** 0.5
    weight = jax.random.uniform(kw, (C_OUT, C_IN, K, K),
                                minval=-bound, maxval=bound, dtype=jnp.float32)

    # 1) Freshly-initialized BN (init_bn): gamma=1, beta=0, running stats 0/1.
    x1 = jax.random.normal(kx1, (N, C_IN, 16, 16), dtype=jnp.float32)
    ones = jnp.ones((C_OUT,), jnp.float32)
    zeros = jnp.zeros((C_OUT,), jnp.float32)
    _check(x1, weight, ones, zeros, zeros, ones, stride=1, padding=0)

    # 2) Non-trivial BN stats, spatial padding, explicit row tiles (4 tiles).
    x2 = jax.random.normal(kx2, (N, C_IN, 32, 32), dtype=jnp.float32)
    gamma = jax.random.uniform(kg, (C_OUT,), minval=0.5, maxval=1.5)
    beta = 0.1 * jax.random.normal(kb, (C_OUT,))
    mean = 0.1 * jax.random.normal(km, (C_OUT,))
    var = jax.random.uniform(kv, (C_OUT,), minval=0.5, maxval=1.5)
    _check(x2, weight, gamma, beta, mean, var, stride=1, padding=1, tile_h=8)

    # 3) Strided conv with padding.
    x3 = jax.random.normal(kx3, (N, C_IN, 16, 16), dtype=jnp.float32)
    _check(x3, weight, gamma, beta, mean, var, stride=2, padding=1)

    print("KERNEL_OK")
</pallas_src>

<mosaic_0001>
module attributes {stable_mosaic.version = 11 : i64} {
  func.func @_conv_bn_relu_kernel(%arg0: i32, %arg1: i32, %arg2: memref<1x16x16x16xbf16, #tpu.memory_space<vmem>>, %arg3: memref<144x128xbf16, #tpu.memory_space<vmem>>, %arg4: memref<1x128xf32, #tpu.memory_space<vmem>>, %arg5: memref<1x14x14x128xbf16, #tpu.memory_space<vmem>>) attributes {dimension_semantics = [#tpu.dimension_semantics<parallel>, #tpu.dimension_semantics<parallel>], iteration_bounds = array<i64: 2, 1>, scalar_prefetch = 0 : i64, scratch_operands = 0 : i64, tpu.core_type = #tpu.core_type<tc>, window_params = [{transform_indices = @transform_0, window_bounds = array<i64: 1, 16, 16, 16>}, {pipeline_mode = #tpu.pipeline_mode<synchronous>, transform_indices = @transform_1, window_bounds = array<i64: 144, 128>}, {pipeline_mode = #tpu.pipeline_mode<synchronous>, transform_indices = @transform_2, window_bounds = array<i64: 1, 128>}, {transform_indices = @transform_3, window_bounds = array<i64: 1, 14, 14, 128>}]} {
    %c14_i32 = arith.constant 14 : i32
    %0 = arith.muli %arg1, %c14_i32 : i32
    %c0 = arith.constant 0 : index
    %1 = arith.index_cast %0 : i32 to index
    %c0_0 = arith.constant 0 : index
    %c0_1 = arith.constant 0 : index
    %2 = vector.load %arg2[%c0, %1, %c0_0, %c0_1] : memref<1x16x16x16xbf16, #tpu.memory_space<vmem>>, vector<1x16x16x16xbf16>
    %3 = vector.shape_cast %2 : vector<1x16x16x16xbf16> to vector<16x16x16xbf16>
    %4 = vector.extract_strided_slice %3 {offsets = [0, 0, 0], sizes = [14, 14, 16], strides = [1, 1, 1]} : vector<16x16x16xbf16> to vector<14x14x16xbf16>
    %5 = vector.extract_strided_slice %3 {offsets = [0, 1, 0], sizes = [14, 14, 16], strides = [1, 1, 1]} : vector<16x16x16xbf16> to vector<14x14x16xbf16>
    %6 = vector.extract_strided_slice %3 {offsets = [0, 2, 0], sizes = [14, 14, 16], strides = [1, 1, 1]} : vector<16x16x16xbf16> to vector<14x14x16xbf16>
    %7 = vector.extract_strided_slice %3 {offsets = [1, 0, 0], sizes = [14, 14, 16], strides = [1, 1, 1]} : vector<16x16x16xbf16> to vector<14x14x16xbf16>
    %8 = vector.extract_strided_slice %3 {offsets = [1, 1, 0], sizes = [14, 14, 16], strides = [1, 1, 1]} : vector<16x16x16xbf16> to vector<14x14x16xbf16>
    %9 = vector.extract_strided_slice %3 {offsets = [1, 2, 0], sizes = [14, 14, 16], strides = [1, 1, 1]} : vector<16x16x16xbf16> to vector<14x14x16xbf16>
    %10 = vector.extract_strided_slice %3 {offsets = [2, 0, 0], sizes = [14, 14, 16], strides = [1, 1, 1]} : vector<16x16x16xbf16> to vector<14x14x16xbf16>
    %11 = vector.extract_strided_slice %3 {offsets = [2, 1, 0], sizes = [14, 14, 16], strides = [1, 1, 1]} : vector<16x16x16xbf16> to vector<14x14x16xbf16>
    %12 = vector.extract_strided_slice %3 {offsets = [2, 2, 0], sizes = [14, 14, 16], strides = [1, 1, 1]} : vector<16x16x16xbf16> to vector<14x14x16xbf16>
    %13 = tpu.concatenate %4, %5, %6, %7, %8, %9, %10, %11, %12 in 2 : vector<14x14x16xbf16>, vector<14x14x16xbf16>, vector<14x14x16xbf16>, vector<14x14x16xbf16>, vector<14x14x16xbf16>, vector<14x14x16xbf16>, vector<14x14x16xbf16>, vector<14x14x16xbf16>, vector<14x14x16xbf16> -> vector<14x14x144xbf16>
    %14 = vector.shape_cast %13 : vector<14x14x144xbf16> to vector<196x144xbf16>
    %cst = arith.constant 0.000000e+00 : bf16
    %15 = vector.broadcast %cst : bf16 to vector<4x144xbf16>
    %16 = tpu.concatenate %14, %15 in 0 : vector<196x144xbf16>, vector<4x144xbf16> -> vector<200x144xbf16>
    %c0_2 = arith.constant 0 : index
    %c0_3 = arith.constant 0 : index
    %17 = vector.load %arg3[%c0_2, %c0_3] : memref<144x128xbf16, #tpu.memory_space<vmem>>, vector<144x128xbf16>
    %cst_4 = arith.constant dense<0.000000e+00> : vector<200x128xf32>
    %18 = tpu.matmul %16, %17, %cst_4 {dimension_numbers = #tpu.dot_dimension_numbers<[1], [0], [0], [1], [0, 0, 1, 1], [], []>} : vector<200x144xbf16>, vector<144x128xbf16>, vector<200x128xf32> -> vector<200x128xf32>
    %c0_5 = arith.constant 0 : index
    %c0_6 = arith.constant 0 : index
    %19 = vector.load %arg4[%c0_5, %c0_6] : memref<1x128xf32, #tpu.memory_space<vmem>>, vector<1x128xf32>
    %20 = vector.broadcast %19 : vector<1x128xf32> to vector<200x128xf32>
    %21 = arith.addf %18, %20 : vector<200x128xf32>
    %cst_7 = arith.constant 0.000000e+00 : f32
    %22 = vector.broadcast %cst_7 : f32 to vector<200x128xf32>
    %23 = arith.maximumf %21, %22 : vector<200x128xf32>
    %24 = vector.extract_strided_slice %23 {offsets = [0, 0], sizes = [196, 128], strides = [1, 1]} : vector<200x128xf32> to vector<196x128xf32>
    %25 = vector.shape_cast %24 : vector<196x128xf32> to vector<14x14x128xf32>
    %26 = arith.truncf %25 : vector<14x14x128xf32> to vector<14x14x128xbf16>
    %c0_8 = arith.constant 0 : index
    %c0_9 = arith.constant 0 : index
    %c0_10 = arith.constant 0 : index
    %c0_11 = arith.constant 0 : index
    %27 = vector.load %arg5[%c0_8, %c0_9, %c0_10, %c0_11] : memref<1x14x14x128xbf16, #tpu.memory_space<vmem>>, vector<1x14x14x128xbf16>
    %28 = vector.shape_cast %27 : vector<1x14x14x128xbf16> to vector<14x14x128xbf16>
    %29 = vector.shape_cast %26 : vector<14x14x128xbf16> to vector<1x14x14x128xbf16>
    tpu.vector_store %arg5[%c0_8, %c0_9, %c0_10, %c0_11], %29 {strides = array<i32>} : memref<1x14x14x128xbf16, #tpu.memory_space<vmem>>, vector<1x14x14x128xbf16>,
    return
  }
  func.func @transform_0(%arg0: i32, %arg1: i32) -> (i32, i32, i32, i32) {
    %c0_i32 = arith.constant 0 : i32
    %c0_i32_0 = arith.constant 0 : i32
    %c0_i32_1 = arith.constant 0 : i32
    %c0_i32_2 = arith.constant 0 : i32
    return %arg0, %c0_i32, %c0_i32_0, %c0_i32_1 : i32, i32, i32, i32
  }
  func.func @transform_1(%arg0: i32, %arg1: i32) -> (i32, i32) {
    %c0_i32 = arith.constant 0 : i32
    %c0_i32_0 = arith.constant 0 : i32
    %c0_i32_1 = arith.constant 0 : i32
    return %c0_i32, %c0_i32_0 : i32, i32
  }
  func.func @transform_2(%arg0: i32, %arg1: i32) -> (i32, i32) {
    %c0_i32 = arith.constant 0 : i32
    %c0_i32_0 = arith.constant 0 : i32
    %c0_i32_1 = arith.constant 0 : i32
    return %c0_i32, %c0_i32_0 : i32, i32
  }
  func.func @transform_3(%arg0: i32, %arg1: i32) -> (i32, i32, i32, i32) {
    %c0_i32 = arith.constant 0 : i32
    %c0_i32_0 = arith.constant 0 : i32
    %c0_i32_1 = arith.constant 0 : i32
    return %arg0, %arg1, %c0_i32, %c0_i32_0 : i32, i32, i32, i32
  }
}

</mosaic_0001>

<bundles_post_ra>
// kernel: tpu_custom_call.1
= control target key start
LH: loop header
LB: loop body
LE: loop exit
PB: predicated region body
PF: predicated region fallthrough
CT: control target
= control target key end

     0   :  { %8 = vsyncpa [#allocation3], 0  ;;  %s5320_s0 = inlined_call_operand.hbm [shape: bf16[2,16,16,16], index: 0, kind: input, shape index: {}]   ;;  %s5321_s1 = inlined_call_operand.hbm [shape: bf16[144,128], index: 1, kind: input, shape index: {}]   ;;  %s5322_s2 = inlined_call_operand.vmem [shape: f32[1,128], index: 2, kind: input, shape index: {}]   ;;  %s5323_s3 = inlined_call_operand.vmem [shape: bf16[2,14,14,128], index: 3, kind: output, shape index: {}]  }
   0x1   :  { %10 = vsyncpa [#allocation3 + $0x1], 0 }
   0x2   :  { %11 = vsyncpa [#allocation5], 0  ;;  %s4256_s12 = smov 0   ;;  %s4258_s13 = smov 0  }
   0x3   :  { %s4260_s14 = smov 0   ;;  %s4262_s15 = smov 0  }
   0x4   :  { %s4264_s16 = smov 0   ;;  %s4266_s17 = smov 0  }
   0x5 LB: > { %s3868_s18 = sadd.s32 4294967295, %s4220_s17   ;;  %p49_p0 = scmp.ne.s32.totalorder %s4204_s13, %s4200_s12  ;;  %s4220_s17 = sphi %s4266_s17, %s17_s17   ;;  %s4216_s16 = sphi %s4264_s16, %s5333_s16   ;;  %s4212_s15 = sphi %s4262_s15, %s5332_s15   ;;  %s4208_s14 = sphi %s4260_s14, %s5331_s14   ;;  %s4204_s13 = sphi %s4258_s13, %s5330_s13   ;;  %s4200_s12 = sphi %s4256_s12, %s5329_s12  }
   0x6   : > { %p4286_p1 = scmp.eq.s32.totalorder %s3868_s18, 0  ;;  %p3870_p2 = scmp.ge.s32.totalorder %s4220_s17, 1 }
   0x7   : > { %p130_p3 = scmp.lt.s32.totalorder %s4220_s17, 3  ;;  %s4222_s22 = smov [#allocation4]  }
   0x8   : > { %p4294_p4 = por %p4286_p1, %p49_p0  ;;  %s142_s23 = sshll.u32 %s4222_s22, 4  ;;  %s143_s23 = int_to_ptr.vmem [resolvable:$true] %s142_s23 }
   0x9   : > { %p4298_p5 = pnand %p3870_p2, %p130_p3  ;;  %s29_s25 = sadd.s32 1, %s4216_s16 }
   0xa   : > { %s4123_s26 = scalar_lea.vmem %s143_s23, 1152  ;;  %p4131_p12 = scmp.lt.s32.totalorder %s143_s23, %s143_s23 }
   0xb   : > { %p4011_p6 = pneg %p4298_p5  ;;  %p4124_p9 = scmp.ne.s32.totalorder %s143_s23, %s4123_s26 }
   0xc   : > { %p4132_p13 = scmp.lt.s32.totalorder %s4123_s26, %s4123_s26 }
   0xd   : > { %p4306_p7 = pnand %p4011_p6, %p4286_p1 }
   0xe   : > { %p4133_p0 = por %p4132_p13, %p4131_p12 }
   0xf   : > { %p4114_p8 = pneg %p4306_p7 }
  0x11   : > { %p4126_p10 = pnand %p4124_p9, %p4114_p8 }
  0x13   : > { %p4127_p11 = pneg %p4126_p10 }
  0x15   : > { %p4134_p2 = pnand %p4133_p0, %p4127_p11 }
  0x17   : > { %4137 = shalt.err (!%p4134_p2)
}
  0x18   : > { %s4223_s27 = smov 64   ;;  %s4224_s28 = smov 4  }
  0x19   : > { %4014 = dma.hbm_to_vmem [thread:$0]  (!%p4306_p7), %s5321_s1, 1152, %s143_s23, [#allocation5], %s4223_s27, %s4223_s27, %s4224_s28  }
  0x1a   : > { %p31_p3 = scmp.ge.s32.totalorder %s29_s25, 2  ;;  %s36_s4 = sadd.s32 1, %s4208_s14 }
  0x1b   : > { %p43_p6 = scmp.ne.s32.totalorder %s4208_s14, %s4204_s13  ;;  %p44_p8 = scmp.eq.s32.totalorder %s4220_s17, 0 }
  0x1c   : > { %s5335_s25 = smov (%p31_p3, %s29_s25), 0  ;;  %p4020_p10 = scmp.lt.s32.totalorder %s4220_s17, 2 }
  0x1d   : > { %p45_p9 = por %p44_p8, %p43_p6  ;;  %s33_s5 = ssub.s32 %s4216_s16, %s5335_s25 }
  0x1e   : > { %s159_s6 = sand.u32 1, %s4208_s14   ;;  %p34_p11 = scmp.eq.s32.totalorder %s33_s5, 0 }
  0x1f   : > { %s3873_s7 = sshll.u32 %s159_s6, 7  ;;  %s3957_s8 = sshll.u32 %s4216_s16, 11 }
  0x20   : > { %s4333_s9 = scalar_select %p34_p11, %s4208_s14, %s36_s4  }
  0x21   : > { %s169_s12 = scalar_lea.hbm %s5320_s0, %s3957_s8  ;;  %s163_s18 = scalar_lea.vmem [#allocation2], %s3873_s7 }
  0x22   : > { %s170_s22 = sshll.u32 %s163_s18, 4  ;;  %p4338_p7 = pnand %p4020_p10, %p45_p9  ;;  %s171_s22 = int_to_ptr.vmem [resolvable:$true] %s170_s22 }
  0x23   : > { %s160_s24 = scalar_lea.sflag [#allocation3], %s159_s6  ;;  %s4151_s26 = scalar_lea.vmem %s171_s22, 2048 }
  0x24   : > { %p4140_p12 = pneg %p4338_p7  ;;  %p4152_p13 = scmp.ne.s32.totalorder %s171_s22, %s4151_s26 }
  0x25   : > { %s4225_s29 = smov [#allocation2]  }
  0x26   : > { %p4154_p0 = pnand %p4152_p13, %p4140_p12  ;;  %s4156_s30 = sshll.u32 %s4225_s29, 4  ;;  %s4157_s30 = int_to_ptr.vmem [resolvable:$false] %s4156_s30 }
  0x27   : > { %s4158_s4 = scalar_lea.vmem %s4157_s30, 4096  ;;  %p4159_p3 = scmp.lt.s32.totalorder %s171_s22, %s4157_s30 }
  0x28   : > { %p4155_p2 = pneg %p4154_p0  ;;  %p4160_p6 = scmp.lt.s32.totalorder %s4158_s4, %s4151_s26 }
  0x2a   : > { %p4161_p8 = por %p4160_p6, %p4159_p3 }
  0x2c   : > { %p4162_p9 = pnand %p4161_p8, %p4155_p2 }
  0x2e   : > { %4165 = shalt.err (!%p4162_p9)
}
  0x2f   : > { %4018 = dma.hbm_to_vmem [thread:$0]  (!%p4338_p7), %s169_s12, 2048, %s171_s22, %s160_s24, %s4223_s27, %s4223_s27, %s4224_s28  }
  0x30   : > { %182 = sbr.rel (%p4298_p5) target bundleno = 604 (0x25c), region = 32  ;;  %s184_s5 = sand.u32 (!%p4298_p5), 1, %s4204_s13  }
  0x31   : > { %s3877_s6 = sshll.u32 (!%p4298_p5), %s184_s5, 7  ;;  %s185_s7 = scalar_lea.sflag (!%p4298_p5), [#allocation3], %s184_s5 }
  0x32   : > { %s4352_s8 = scalar_lea.vmem (!%p4298_p5), [#allocation2], %s3877_s6 }
  0x35   : > { %4191 = dma.done.wait (%p4294_p4), %s185_s7, 2048  }
  0x36   : > { %4193 = vsyncadd (%p4294_p4), %s185_s7, 4294965248 }
  0x37   : > { %4195 = dma.done.wait (%p4286_p1), [#allocation5], 1152  }
  0x38   : > { %4197 = vsyncadd (%p4286_p1), [#allocation5], 4294966144  ;;  %v4363_v0 = vld [vmem:[%s4352_s8 + $0x10] sm:$0xff]   ;;  %v4226_v1 = vmov 0   ;;  %v4368_v2 = vld [vmem:[%s4352_s8 + $0x8] sm:$0xff]   ;;  %s4227_s20 = smov 48  }
  0x39   : > { %2526 = vmatprep.subr.bf16.mxu0 %v4226_v1  ;;  %3986 = vmatprep.subr.bf16.mxu1 %v4226_v1  ;;  %v4373_v3 = vld [vmem:[%s4352_s8] sm:$0xff]   ;;  %v348_v4 = vshll.u32 %v4368_v2, 16  ;;  %v465_v7 = vrot.slane %v4368_v2, 1  ;;  %v355_v8 = vshll.u32 %v4363_v0, 16  ;;  %s4228_s19 = smov 32   ;;  %s4229_s21 = smov 96  }
  0x3a   : > { %513 = vrot.lane.b32.xlu0 %v4363_v0, %s4227_s20  ;;  %511 = vrot.lane.b32.xlu1 %v4368_v2, %s4227_s20  ;;  %v464_v5 = vrot.slane %v4373_v3, 1  ;;  %v341_v6 = vshll.u32 %v4373_v3, 16  ;;  %v339_v9 = vshrl.u32 %v4373_v3, 16  ;;  %v346_v11 = vshrl.u32 %v4368_v2, 16  ;;  %s4230_s27 = smov 80   ;;  %s4231_s28 = smov 16  }
  0x3b   : > { %v350_v12 = vrot.slane %v348_v4, 1  ;;  %v353_v14 = vshrl.u32 %v4363_v0, 16  ;;  %v357_v15 = vrot.slane %v355_v8, 1  ;;  %v4392_v18 = vld [vmem:[%s4352_s8 + $0x18] sm:$0xff]   ;;  %s4232_s10 = smov 64   ;;  %v4397_v19 = vrot.slane %v4363_v0, 1 }
  0x3c   : > { %v343_v10 = vrot.slane %v341_v6, 1  ;;  %v362_v20 = vshll.u32 %v4392_v18, 16  ;;  %v4095_v21 = vld [vmem:[#allocation4 + $0x38] sm:$0xff]   ;;  %v4096_v22 = vld [vmem:[#allocation4 + $0x30] sm:$0xff]   ;;  %v360_v23 = vshrl.u32 %v4392_v18, 16  ;;  %s4233_s11 = smov 112  }
  0x3d   : > { %v351_v16 = vor.u32 %v350_v12, %v346_v11  ;;  %v358_v17 = vor.u32 %v357_v15, %v353_v14  ;;  %2527 = vmatpush1.bf16.msra.mxu0 %v4095_v21  ;;  %3995 = vmatpush1.bf16.msra.mxu1 %v4095_v21  ;;  %v4099_v25 = vld [vmem:[#allocation4 + $0x28] sm:$0xff]   ;;  %v4412_v27 = vld [vmem:[%s4352_s8 + $0x20] sm:$0xff]   ;;  %v4101_v32 = vld [vmem:[#allocation4 + $0x18] sm:$0xff]   ;;  %v4430_v33 = vrot.slane %v4392_v18, 1  ;;  %vm672_vm0 = vcmask 130048   ;;  %p221_p1 = scmp.lt.s32.totalorder %s4212_s15, 1 }
  0x3e   : > { %478 = vrot.lane.b32.xlu0 %v464_v5, %s4228_s19  ;;  %608 = vrot.lane.b32.xlu1 %v4363_v0, %s4229_s21  ;;  %v344_v13 = vor.u32 %v343_v10, %v339_v9  ;;  %v364_v24 = vrot.slane %v362_v20, 1  ;;  %v4415_v28 = vld [vmem:[%s4352_s8 + $0x40] sm:$0xff]   ;;  %v369_v31 = vshll.u32 %v4412_v27, 16  ;;  %v4434_v36 = vld [vmem:[%s4352_s8 + $0x48] sm:$0xff]   ;;  %v367_v37 = vshrl.u32 %v4412_v27, 16  ;;  %v4102_v39 = vld [vmem:[#allocation4 + $0x10] sm:$0xff]  }
  0x3f   : > { %2528 = vmatprep.subr.bf16.mxu0 %v4226_v1  ;;  %3987 = vmatprep.subr.bf16.mxu1 %v4226_v1  ;;  %v4100_v29 = vld [vmem:[#allocation4 + $0x20] sm:$0xff]   ;;  %v397_v30 = vshll.u32 %v4415_v28, 16  ;;  %v395_v34 = vshrl.u32 %v4415_v28, 16  ;;  %v404_v41 = vshll.u32 %v4434_v36, 16  ;;  %v4103_v43 = vld [vmem:[#allocation4 + $0x8] sm:$0xff]   ;;  %v4454_v44 = vrot.slane %v4415_v28, 1 }
  0x40   : > { %v365_v26 = vor.u32 %v364_v24, %v360_v23  ;;  %v371_v38 = vrot.slane %v369_v31, 1  ;;  %v402_v45 = vshrl.u32 %v4434_v36, 16  ;;  %v4104_v47 = vld [vmem:[#allocation4] sm:$0xff]   ;;  %v4473_v50 = vrot.slane %v4434_v36, 1  ;;  %v4476_v51 = vld [vmem:[%s4352_s8 + $0x50] sm:$0xff]   ;;  %v4499_v57 = vld [vmem:[%s4352_s8 + $0x28] sm:$0xff]  }
  0x41   : > { %2529 = vmatpush1.bf16.msra.mxu0 %v4096_v22  ;;  %3996 = vmatpush1.bf16.msra.mxu1 %v4096_v22  ;;  %v399_v35 = vrot.slane %v397_v30, 1  ;;  %v406_v46 = vrot.slane %v404_v41, 1  ;;  %v4106_v49 = vld [vmem:[#allocation4 + $0x40] sm:$0xff]   ;;  %v411_v52 = vshll.u32 %v4476_v51, 16  ;;  %v409_v53 = vshrl.u32 %v4476_v51, 16  ;;  %v4510_v60 = vld [vmem:[%s4352_s8 + $0x58] sm:$0xff]  }
  0x42   : > { %480 = vrot.lane.b32.xlu0 %v465_v7, %s4228_s19  ;;  %575 = vrot.lane.b32.xlu1 %v465_v7, %s4230_s27  ;;  %v4447_v42 = vor.u32 %v371_v38, %v367_v37  ;;  %v4496_v56 = vrot.slane %v4412_v27, 1  ;;  %v4504_v58 = vrot.slane %v4476_v51, 1  ;;  %v376_v59 = vshll.u32 %v4499_v57, 16  ;;  %v4093_v7 = vld [vmem:[%s4352_s8 + $0x60] sm:$0xff]   ;;  %v4094_v12 = vld [vmem:[%s4352_s8 + $0x30] sm:$0xff]   ;;  %s5337_s15 = smov (!%p221_p1, %s4212_s15), 1 }
  0x43   : > { %2530 = vmatprep.subr.bf16.mxu0 %v4226_v1  ;;  %3988 = vmatprep.subr.bf16.mxu1 %v4226_v1  ;;  %v4442_v40 = vor.u32 %v399_v35, %v395_v34  ;;  %v4463_v48 = vor.u32 %v406_v46, %v402_v45  ;;  %v413_v54 = vrot.slane %v411_v52, 1  ;;  %v418_v61 = vshll.u32 %v4510_v60, 16  ;;  %s4004_s22 = smul.u32 112, %s5337_s15 }
  0x44   : > { %v374_v62 = vshrl.u32 %v4499_v57, 16  ;;  %v378_v63 = vrot.slane %v376_v59, 1  ;;  %v4536_v8 = vrot.slane %v4510_v60, 1  ;;  %v425_v9 = vshll.u32 %v4093_v7, 16 }
  0x45   : > { %2531 = vmatpush1.bf16.msra.mxu0 %v4099_v25  ;;  %3997 = vmatpush1.bf16.msra.mxu1 %v4099_v25  ;;  %v414_v55 = vor.u32 %v413_v54, %v409_v53  ;;  %v420_v4 = vrot.slane %v418_v61, 1  ;;  %v423_v10 = vshrl.u32 %v4093_v7, 16  ;;  %v383_v15 = vshll.u32 %v4094_v12, 16  ;;  %v4567_v25 = vld [vmem:[%s4352_s8 + $0x38] sm:$0xff]   ;;  %s5143_s26 = scalar_lea.vmem %s5323_s3, %s4004_s22 }
  0x46   : > { %436 = vrot.lane.b32.xlu0 %v344_v13, %s4231_s28  ;;  %438 = vrot.lane.b32.xlu1 %v351_v16, %s4231_s28  ;;  %v379_v5 = vor.u32 %v378_v63, %v374_v62  ;;  %v427_v11 = vrot.slane %v425_v9, 1  ;;  %v4545_v13 = vrot.slane %v4499_v57, 1  ;;  %v4575_v31 = vrot.slane %v4094_v12, 1 }
  0x47   : > { %2532 = vmatprep.subr.bf16.mxu0 %v4226_v1  ;;  %3989 = vmatprep.subr.bf16.mxu1 %v4226_v1  ;;  %vm701_vm1 = vcmask 261120   ;;  %v4580_v34 = vrot.slane %v4093_v7, 1  ;;  %vm730_vm2 = vcmask 392192   ;;  %v4234_v41 = vmov 1966171168  }
  0x48   : > { %v4548_v14 = vor.u32 %v427_v11, %v423_v10  ;;  %v388_v46 = vshrl.u32 %v4567_v25, 16  ;;  %vm759_vm3 = vcmask 523264   ;;  %vm788_vm4 = vcmask 654336  }
  0x49   : > { %2533 = vmatpush1.bf16.msra.mxu0 %v4100_v29  ;;  %3998 = vmatpush1.bf16.msra.mxu1 %v4100_v29  ;;  %vm817_vm5 = vcmask 785408   ;;  %vm846_vm6 = vcmask 916480   ;;  %vm2402_vm7 = vcmask 1041408  }
  0x4a   : > { %548 = vrot.lane.b32.xlu0 %v358_v17, %s4232_s10  ;;  %546 = vrot.lane.b32.xlu1 %v351_v16, %s4232_s10  ;;  %v381_v16 = vshrl.u32 %v4094_v12, 16 }
  0x4b   : > { %2534 = vmatprep.subr.bf16.mxu0 %v4226_v1  ;;  %3990 = vmatprep.subr.bf16.mxu1 %v4226_v1 }
  0x4d   : > { %2535 = vmatpush1.bf16.msra.mxu0 %v4101_v32  ;;  %3999 = vmatpush1.bf16.msra.mxu1 %v4101_v32  ;;  %v390_v32 = vshll.u32 %v4567_v25, 16 }
  0x4e   : > { %577 = vrot.lane.b32.xlu0 %v4397_v19, %s4230_s27  ;;  %643 = vrot.lane.b32.xlu1 %v358_v17, %s4233_s11 }
  0x4f   : > { %2536 = vmatprep.subr.bf16.mxu0 %v4226_v1  ;;  %3991 = vmatprep.subr.bf16.mxu1 %v4226_v1 }
  0x51   : > { %2537 = vmatpush1.bf16.msra.mxu0 %v4102_v39  ;;  %4000 = vmatpush1.bf16.msra.mxu1 %v4102_v39 }
  0x52   : > { %610 = vrot.lane.b32.xlu0 %v4392_v18, %s4229_s21  ;;  %440 = vrot.lane.b32.xlu1 %v358_v17, %s4231_s28  ;;  %v385_v17 = vrot.slane %v383_v15, 1 }
  0x53   : > { %2538 = vmatprep.subr.bf16.mxu0 %v4226_v1  ;;  %3992 = vmatprep.subr.bf16.mxu1 %v4226_v1 }
  0x54   : > { %v4556_v20 = vor.u32 %v385_v17, %v381_v16 }
  0x55   : > { %2539 = vmatpush1.bf16.msra.mxu0 %v4103_v43  ;;  %4001 = vmatpush1.bf16.msra.mxu1 %v4103_v43  ;;  %v894_v43 = vlaneseq }
  0x56   : > { %645 = vrot.lane.b32.xlu0 %v365_v26, %s4233_s11  ;;  %482 = vrot.lane.b32.xlu1 %v4397_v19, %s4228_s19 }
  0x57   : > { %2540 = vmatprep.subr.bf16.mxu0 %v4226_v1  ;;  %3993 = vmatprep.subr.bf16.mxu1 %v4226_v1  ;;  %v4595_v61 = vshrl.u32 %v894_v43, 7 }
  0x59   : > { %2541 = vmatpush1.bf16.msra.mxu0 %v4104_v47  ;;  %4002 = vmatpush1.bf16.msra.mxu1 %v4104_v47  ;;  %v392_v47 = vrot.slane %v390_v32, 1 }
  0x5a   : > { %515 = vrot.lane.b32.xlu0 %v4392_v18, %s4227_s20  ;;  %550 = vrot.lane.b32.xlu1 %v365_v26, %s4232_s10 }
  0x5b   : > { %2556 = vmatprep.subr.bf16.mxu0 %v4226_v1  ;;  %3994 = vmatprep.subr.bf16.mxu1 %v4226_v1  ;;  %v416_v1 = vshrl.u32 %v4510_v60, 16  ;;  %v4600_v63 = vor.u32 %v392_v47, %v388_v46 }
  0x5d   : > { %2557 = vmatpush2.bf16.msra.mxu0 %v4106_v49  ;;  %4003 = vmatpush2.bf16.msra.mxu1 %v4106_v49  ;;  %v421_v6 = vor.u32 %v420_v4, %v416_v1 }
  0x5e   : > { %579 = vrot.lane.b32.xlu0 %v4430_v33, %s4230_s27  ;;  %612 = vrot.lane.b32.xlu1 %v4412_v27, %s4229_s21 }
  0x62   : > { %452 = vrot.lane.b32.xlu0 %v4442_v40, %s4231_s28  ;;  %647 = vrot.lane.b32.xlu1 %v4447_v42, %s4233_s11 }
  0x66   : > { %494 = vrot.lane.b32.xlu0 %v4454_v44, %s4228_s19  ;;  %442 = vrot.lane.b32.xlu1 %v365_v26, %s4231_s28  ;;  %v4571_v26 = vld [vmem:[%s4352_s8 + $0x68] sm:$0xff]  }
  0x67   : > { %v432_v35 = vshll.u32 %v4571_v26, 16  ;;  %v430_v52 = vshrl.u32 %v4571_v26, 16 }
  0x6a   : > { %454 = vrot.lane.b32.xlu0 %v4463_v48, %s4231_s28  ;;  %527 = vrot.lane.b32.xlu1 %v4434_v36, %s4227_s20 }
  0x6e   : > { %484 = vrot.lane.b32.xlu0 %v4430_v33, %s4228_s19  ;;  %496 = vrot.lane.b32.xlu1 %v4473_v50, %s4228_s19 }
  0x72   : > { %562 = vrot.lane.b32.xlu0 %v4463_v48, %s4232_s10  ;;  %517 = vrot.lane.b32.xlu1 %v4412_v27, %s4227_s20 }
  0x76   : > { %529 = vrot.lane.b32.xlu0 %v4476_v51, %s4227_s20  ;;  %591 = vrot.lane.b32.xlu1 %v4473_v50, %s4230_s27 }
  0x7a   : > { %552 = vrot.lane.b32.xlu0 %v4447_v42, %s4232_s10  ;;  %564 = vrot.lane.b32.xlu1 %v414_v55, %s4232_s10 }
  0x7e   : > { %624 = vrot.lane.b32.xlu0 %v4476_v51, %s4229_s21  ;;  %581 = vrot.lane.b32.xlu1 %v4496_v56, %s4230_s27 }
  0x82   : > { %593 = vrot.lane.b32.xlu0 %v4504_v58, %s4230_s27  ;;  %659 = vrot.lane.b32.xlu1 %v414_v55, %s4233_s11 }
  0x86   : > { %614 = vrot.lane.b32.xlu0 %v4499_v57, %s4229_s21  ;;  %626 = vrot.lane.b32.xlu1 %v4510_v60, %s4229_s21 }
  0x8a   : > { %456 = vrot.lane.b32.xlu0 %v414_v55, %s4231_s28  ;;  %649 = vrot.lane.b32.xlu1 %v379_v5, %s4233_s11 }
  0x8e   : > { %661 = vrot.lane.b32.xlu0 %v421_v6, %s4233_s11  ;;  %498 = vrot.lane.b32.xlu1 %v4504_v58, %s4228_s19 }
  0x92   : > { %444 = vrot.lane.b32.xlu0 %v4447_v42, %s4231_s28  ;;  %531 = vrot.lane.b32.xlu1 %v4510_v60, %s4227_s20  ;;  %v892_v42 = vunpack.c.l.s4 %v4234_v41 }
  0x94   : > { %v893_v59 = vunpack.c.0.s8 %v892_v42 }
  0x96   : > { %486 = vrot.lane.b32.xlu0 %v4496_v56, %s4228_s19  ;;  %566 = vrot.lane.b32.xlu1 %v421_v6, %s4232_s10 }
  0x9a   : > { %519 = vrot.lane.b32.xlu0 %v4499_v57, %s4227_s20  ;;  %595 = vrot.lane.b32.xlu1 %v4536_v8, %s4230_s27 }
  0x9e   : > { %554 = vrot.lane.b32.xlu0 %v379_v5, %s4232_s10  ;;  %628 = vrot.lane.b32.xlu1 %v4093_v7, %s4229_s21 }
  0xa2   : > { %583 = vrot.lane.b32.xlu0 %v4545_v13, %s4230_s27  ;;  %663 = vrot.lane.b32.xlu1 %v4548_v14, %s4233_s11 }
  0xa6   : > { %616 = vrot.lane.b32.xlu0 %v4094_v12, %s4229_s21  ;;  %446 = vrot.lane.b32.xlu1 %v379_v5, %s4231_s28 }
  0xaa   : > { %458 = vrot.lane.b32.xlu0 %v421_v6, %s4231_s28  ;;  %651 = vrot.lane.b32.xlu1 %v4556_v20, %s4233_s11 }
  0xac   : > { %v514_v21 = vpop.permute.xlu0 %513  ;;  %v512_v22 = vpop.permute.xlu1 %511 }
  0xae   : > { %488 = vrot.lane.b32.xlu0 %v4545_v13, %s4228_s19  ;;  %500 = vrot.lane.b32.xlu1 %v4536_v8, %s4228_s19 }
  0xb0   : > { %v479_v23 = vpop.permute.xlu0 %478  ;;  %v609_v24 = vpop.permute.xlu1 %608 }
  0xb2   : > { %521 = vrot.lane.b32.xlu0 %v4094_v12, %s4227_s20  ;;  %533 = vrot.lane.b32.xlu1 %v4093_v7, %s4227_s20  ;;  %v4610_v7 = vsub.s32 %v893_v59, %v4595_v61  ;;  %v4649_v59 = vrot.slane %v4571_v26, 1 }
  0xb4   : > { %v481_v29 = vpop.permute.xlu0 %480  ;;  %v576_v30 = vpop.permute.xlu1 %575 }
  0xb6   : > { %556 = vrot.lane.b32.xlu0 %v4556_v20, %s4232_s10  ;;  %568 = vrot.lane.b32.xlu1 %v4548_v14, %s4232_s10 }
  0xb8   : > { %v437_v37 = vpop.permute.xlu0 %436  ;;  %v439_v38 = vpop.permute.xlu1 %438 }
  0xb9   : > { %v674_v39 = vsel %vm672_vm0, %v4373_v3, %v437_v37  ;;  %v434_v3 = vrot.slane %v432_v35, 1  ;;  %v676_v54 = vsel %vm672_vm0, %v4368_v2, %v439_v38 }
  0xba   : > { %v703_v45 = vsel %vm701_vm1, %v674_v39, %v479_v23  ;;  %585 = vrot.lane.b32.xlu0 %v4575_v31, %s4230_s27  ;;  %597 = vrot.lane.b32.xlu1 %v4580_v34, %s4230_s27  ;;  %v705_v2 = vsel %vm701_vm1, %v676_v54, %v481_v29 }
  0xbb   : > { %v732_v49 = vsel %vm730_vm2, %v703_v45, %v512_v22  ;;  %v4605_v4 = vor.u32 %v434_v3, %v430_v52  ;;  %v734_v11 = vsel %vm730_vm2, %v705_v2, %v514_v21 }
  0xbc   : > { %v549_v53 = vpop.permute.xlu0 %548  ;;  %v547_v55 = vpop.permute.xlu1 %546 }
  0xbd   : > { %v761_v62 = vsel %vm759_vm3, %v732_v49, %v547_v55 }
  0xbe   : > { %618 = vrot.lane.b32.xlu0 %v4567_v25, %s4229_s21  ;;  %v790_v1 = vsel %vm788_vm4, %v761_v62, %v576_v30  ;;  %630 = vrot.lane.b32.xlu1 %v4571_v26, %s4229_s21 }
  0xbf   : > { %v819_v5 = vsel %vm817_vm5, %v790_v1, %v609_v24  ;;  %v763_v24 = vsel %vm759_vm3, %v734_v11, %v549_v53 }
  0xc0   : > { %v578_v6 = vpop.permute.xlu0 %577  ;;  %v644_v9 = vpop.permute.xlu1 %643 }
  0xc1   : > { %v848_v10 = vsel %vm846_vm6, %v819_v5, %v644_v9  ;;  %v792_v30 = vsel %vm788_vm4, %v763_v24, %v578_v6  ;;  %v4657_v6 = vld [vmem:[%s4352_s8 + $0x70] sm:$0xff]  }
  0xc2   : > { %653 = vrot.lane.b32.xlu0 %v4600_v63, %s4233_s11  ;;  %v889_v12 = vcombine.low %v848_v10, %v4397_v19  ;;  %v890_v15 = vcombine.high %v848_v10, %v4397_v19  ;;  %665 = vrot.lane.b32.xlu1 %v4605_v4, %s4233_s11 }
  0xc4   : > { %v611_v16 = vpop.permute.xlu0 %610  ;;  %v897_v17 = vrot.slane %v889_v12, %v4610_v7  ;;  %v904_v22 = vrot.slane %v890_v15, %v4610_v7  ;;  %v441_v23 = vpop.permute.xlu1 %440  ;;  %v542_v15 = vshll.u32 %v4657_v6, 16 }
  0xc5   : > { %v821_v19 = vsel %vm817_vm5, %v792_v30, %v611_v16  ;;  %v678_v46 = vsel %vm672_vm0, %v4363_v0, %v441_v23 }
  0xc6   : > { %460 = vrot.lane.b32.xlu0 %v4548_v14, %s4231_s28  ;;  %v905_v29 = vcombine.high %v897_v17, %v897_v17  ;;  %v906_v21 = vcombine.high %v904_v22, %v904_v22  ;;  %502 = vrot.lane.b32.xlu1 %v4580_v34, %s4228_s19  ;;  %v913_v35 = vrot.slane %v897_v17, %v4610_v7 }
  0xc7   : > { %v920_v14 = vrot.slane %v904_v22, %v4610_v7 }
  0xc8   : > { %v646_v32 = vpop.permute.xlu0 %645  ;;  %v927_v37 = vrot.slane %v905_v29, %v4610_v7  ;;  %v483_v38 = vpop.permute.xlu1 %482  ;;  %v934_v42 = vrot.slane %v906_v21, %v4610_v7  ;;  %v4673_v21 = vrot.slane %v4567_v25, 1 }
  0xc9   : > { %v850_v39 = vsel %vm846_vm6, %v821_v19, %v646_v32  ;;  %v936_v0 = vcombine.high %v920_v14, %v920_v14 }
  0xca   : > { %v938_v41 = vcombine.low %v850_v39, %v4430_v33  ;;  %448 = vrot.lane.b32.xlu0 %v4556_v20, %s4231_s28  ;;  %v1575_v43 = vcombine.low %v913_v35, %v927_v37  ;;  %v3896_v45 = vcombine.high %v913_v35, %v927_v37  ;;  %535 = vrot.lane.b32.xlu1 %v4571_v26, %s4227_s20 }
  0xcb   : > { %v939_v47 = vcombine.high %v850_v39, %v4430_v33  ;;  %v707_v20 = vsel %vm701_vm1, %v678_v46, %v483_v38  ;;  %v1577_v33 = vcombine.low %v920_v14, %v934_v42  ;;  %v540_v14 = vshrl.u32 %v4657_v6, 16 }
  0xcc   : > { %v946_v49 = vrot.slane %v938_v41, %v4610_v7  ;;  %v516_v52 = vpop.permute.xlu0 %515  ;;  %v551_v3 = vpop.permute.xlu1 %550  ;;  %v1585_v62 = vrot.slane %v1575_v43, %v4610_v7  ;;  %v1592_v1 = vrot.slane %v3896_v45, %v4610_v7  ;;  %v544_v42 = vrot.slane %v542_v15, 1 }
  0xcd   : > { %v736_v55 = vsel %vm730_vm2, %v707_v20, %v516_v52  ;;  %v953_v2 = vrot.slane %v939_v47, %v4610_v7  ;;  %v1599_v16 = vrot.slane %v1577_v33, %v4610_v7 }
  0xce   : > { %v954_v53 = vcombine.high %v946_v49, %v946_v49  ;;  %v962_v54 = vrot.slane %v946_v49, %v4610_v7  ;;  %490 = vrot.lane.b32.xlu0 %v4575_v31, %s4228_s19  ;;  %570 = vrot.lane.b32.xlu1 %v4605_v4, %s4232_s10  ;;  %v765_v26 = vsel %vm759_vm3, %v736_v55, %v551_v3 }
  0xcf   : > { %v1608_v22 = vcombine.high %v1585_v62, %v1592_v1  ;;  %v955_v23 = vcombine.high %v953_v2, %v953_v2  ;;  %v969_v24 = vrot.slane %v953_v2, %v4610_v7  ;;  %v1607_v30 = vcombine.low %v1585_v62, %v1592_v1 }
  0xd0   : > { %v580_v5 = vpop.permute.xlu0 %579  ;;  %v976_v9 = vrot.slane %v954_v53, %v4610_v7  ;;  %v1578_v10 = vcombine.low %v936_v0, %v962_v54  ;;  %v613_v11 = vpop.permute.xlu1 %612  ;;  %v984_v39 = vcombine.high %v962_v54, %v962_v54  ;;  %v545_v33 = vor.u32 %v544_v42, %v540_v14 }
  0xd1   : > { %v794_v12 = vsel %vm788_vm4, %v765_v26, %v580_v5  ;;  %v1624_v43 = vrot.slane %v1608_v22, %v4610_v7  ;;  %v983_v47 = vrot.slane %v955_v23, %v4610_v7  ;;  %v1617_v52 = vrot.slane %v1607_v30, %v4610_v7 }
  0xd2   : > { %523 = vrot.lane.b32.xlu0 %v4567_v25, %s4227_s20  ;;  %599 = vrot.lane.b32.xlu1 %v4649_v59, %s4230_s27  ;;  %v1606_v17 = vrot.slane %v1578_v10, %v4610_v7  ;;  %v986_v19 = vcombine.high %v976_v9, %v976_v9  ;;  %v823_v35 = vsel %vm817_vm5, %v794_v12, %v613_v11 }
  0xd3   : > { %v985_v20 = vcombine.high %v969_v24, %v969_v24  ;;  %v1641_v62 = vcombine.low %v976_v9, %v984_v39 }
  0xd4   : > { %v4670_v29 = vpop.permute.xlu0 %452  ;;  %v648_v32 = vpop.permute.xlu1 %647  ;;  %v1610_v37 = vcombine.high %v1599_v16, %v1606_v17  ;;  %v1609_v38 = vcombine.low %v1599_v16, %v1606_v17  ;;  %v1642_v3 = vcombine.low %v986_v19, %v969_v24 }
  0xd5   : > { %v4677_v41 = vsel %vm846_vm6, %v823_v35, %v648_v32  ;;  %v1643_v5 = vcombine.low %v983_v47, %v985_v20  ;;  %v1651_v9 = vrot.slane %v1641_v62, %v4610_v7 }
  0xd6   : > { %558 = vrot.lane.b32.xlu0 %v4600_v63, %s4232_s10  ;;  %v987_v25 = vcombine.low %v4677_v41, %v4496_v56  ;;  %632 = vrot.lane.b32.xlu1 %v4657_v6, %s4229_s21  ;;  %v1638_v45 = vrot.slane %v1610_v37, %v4610_v7  ;;  %v1631_v46 = vrot.slane %v1609_v38, %v4610_v7 }
  0xd7   : > { %v1658_v10 = vrot.slane %v1642_v3, %v4610_v7  ;;  %v1665_v16 = vrot.slane %v1643_v5, %v4610_v7  ;;  %v988_v62 = vcombine.high %v4677_v41, %v4496_v56 }
  0xd8   : > { %v4690_v49 = vpop.permute.xlu0 %494  ;;  %v995_v53 = vrot.slane %v987_v25, %v4610_v7  ;;  %v4694_v54 = vpop.permute.xlu1 %442  ;;  %v1640_v55 = vcombine.low %v1624_v43, %v1638_v45  ;;  %v1639_v0 = vcombine.low %v1617_v52, %v1631_v46  ;;  %v4733_v25 = vld [vmem:[%s4352_s8 + $0x78] sm:$0xff]   ;;  %v4740_v46 = vrot.slane %v4657_v6, 1 }
  0xd9   : > { %v1674_v23 = vcombine.high %v1651_v9, %v1658_v10  ;;  %v1673_v24 = vcombine.low %v1651_v9, %v1658_v10  ;;  %v639_v47 = vshll.u32 %v4733_v25, 16  ;;  %v637_v3 = vshrl.u32 %v4733_v25, 16 }
  0xda   : > { %462 = vrot.lane.b32.xlu0 %v4605_v4, %s4231_s28  ;;  %v1003_v1 = vcombine.high %v995_v53, %v995_v53  ;;  %587 = vrot.lane.b32.xlu1 %v4673_v21, %s4230_s27  ;;  %v4705_v11 = vrot.slane %v995_v53, %v4610_v7  ;;  %v680_v41 = vsel %vm672_vm0, %v4392_v18, %v4694_v54 }
  0xdb   : > { %3913 = vmatprep.mubr.msk.bf16.mxu0 %vm672_vm0, %v1640_v55  ;;  %v1690_v37 = vrot.slane %v1674_v23, %v4610_v7  ;;  %v1683_v39 = vrot.slane %v1673_v24, %v4610_v7  ;;  %v641_v53 = vrot.slane %v639_v47, 1  ;;  %v690_v55 = vsel %vm672_vm0, %v4415_v28, %v4670_v29 }
  0xdc   : > { %v4701_v2 = vpop.permute.xlu0 %454  ;;  %v4708_v26 = vrot.slane %v1003_v1, %v4610_v7  ;;  %2559 = vmatmul.mubr.bf16.vlgmr.msra.gmra.mxu0 %v1639_v0  ;;  %v528_v4 = vpop.permute.xlu1 %527 }
  0xdd   : > { %v642_v10 = vor.u32 %v641_v53, %v637_v3 }
  0xde   : > { %667 = vrot.lane.b32.xlu0 %v545_v33, %s4233_s11  ;;  %v1644_v12 = vcombine.low %v4705_v11, %v4708_v26  ;;  %504 = vrot.lane.b32.xlu1 %v4649_v59, %s4228_s19 }
  0xe0   : > { %v485_v15 = vpop.permute.xlu0 %484  ;;  %v1672_v17 = vrot.slane %v1644_v12, %v4610_v7  ;;  %v4718_v22 = vpop.permute.xlu1 %496  ;;  %v1002_v12 = vrot.slane %v988_v62, %v4610_v7 }
  0xe2   : > { %620 = vrot.lane.b32.xlu0 %v4415_v28, %s4229_s21  ;;  %450 = vrot.lane.b32.xlu1 %v4600_v63, %s4231_s28  ;;  %v1676_v30 = vcombine.high %v1665_v16, %v1672_v17  ;;  %v1675_v19 = vcombine.low %v1665_v16, %v1672_v17  ;;  %v709_v17 = vsel %vm701_vm1, %v680_v41, %v485_v15 }
  0xe4   : > { %v563_v32 = vpop.permute.xlu0 %562  ;;  %v518_v35 = vpop.permute.xlu1 %517  ;;  %v1704_v38 = vrot.slane %v1676_v30, %v4610_v7  ;;  %v1697_v14 = vrot.slane %v1675_v19, %v4610_v7  ;;  %v1004_v30 = vcombine.high %v1002_v12, %v1002_v12 }
  0xe5   : > { %v738_v19 = vsel %vm730_vm2, %v709_v17, %v518_v35 }
  0xe6   : > { %537 = vrot.lane.b32.xlu0 %v4657_v6, %s4227_s20  ;;  %655 = vrot.lane.b32.xlu1 %v4442_v40, %s4233_s11  ;;  %v1706_v42 = vcombine.low %v1690_v37, %v1704_v38  ;;  %v1705_v63 = vcombine.low %v1683_v39, %v1697_v14  ;;  %v719_v6 = vsel %vm701_vm1, %v690_v55, %v4690_v49 }
  0xe7   : > { %v748_v1 = vsel %vm730_vm2, %v719_v6, %v528_v4  ;;  %v3897_v55 = vcombine.high %v4705_v11, %v4708_v26 }
  0xe8   : > { %v530_v43 = vpop.permute.xlu0 %529  ;;  %v592_v45 = vpop.permute.xlu1 %591  ;;  %3914 = vmatprep.mubr.msk.bf16.mxu0 %vm672_vm0, %v1706_v42  ;;  %v777_v5 = vsel %vm759_vm3, %v748_v1, %v563_v32  ;;  %v692_v32 = vsel %vm672_vm0, %v4434_v36, %v4701_v2 }
  0xe9   : > { %2567 = vmatmul.mubr.bf16.gmra.mxu0 %v1705_v63  ;;  %v1018_v63 = vrot.slane %v1002_v12, %v4610_v7 }
  0xea   : > { %492 = vrot.lane.b32.xlu0 %v4673_v21, %s4228_s19  ;;  %572 = vrot.lane.b32.xlu1 %v545_v33, %s4232_s10 }
  0xec   : > { %v553_v52 = vpop.permute.xlu0 %552  ;;  %v565_v20 = vpop.permute.xlu1 %564 }
  0xed   : > { %v767_v18 = vsel %vm759_vm3, %v738_v19, %v553_v52 }
  0xee   : > { %525 = vrot.lane.b32.xlu0 %v4415_v28, %s4227_s20  ;;  %601 = vrot.lane.b32.xlu1 %v4740_v46, %s4230_s27  ;;  %v806_v28 = vsel %vm788_vm4, %v777_v5, %v592_v45 }
  0xf0   : > { %v625_v0 = vpop.permute.xlu0 %624  ;;  %v582_v33 = vpop.permute.xlu1 %581 }
  0xf1   : > { %v835_v49 = vsel %vm817_vm5, %v806_v28, %v625_v0  ;;  %v796_v54 = vsel %vm788_vm4, %v767_v18, %v582_v33 }
  0xf2   : > { %560 = vrot.lane.b32.xlu0 %v4442_v40, %s4232_s10  ;;  %634 = vrot.lane.b32.xlu1 %v4733_v25, %s4229_s21 }
  0xf4   : > { %v594_v29 = vpop.permute.xlu0 %593  ;;  %v660_v9 = vpop.permute.xlu1 %659 }
  0xf5   : > { %v864_v56 = vsel %vm846_vm6, %v835_v49, %v660_v9 }
  0xf6   : > { %589 = vrot.lane.b32.xlu0 %v4454_v44, %s4230_s27  ;;  %v1281_v40 = vcombine.low %v864_v56, %v4504_v58  ;;  %669 = vrot.lane.b32.xlu1 %v642_v10, %s4233_s11  ;;  %v1282_v4 = vcombine.high %v864_v56, %v4504_v58  ;;  %v721_v58 = vsel %vm701_vm1, %v692_v32, %v4718_v22 }
  0xf7   : > { %v750_v37 = vsel %vm730_vm2, %v721_v58, %v530_v43  ;;  %v1034_v10 = vcombine.high %v1018_v63, %v1018_v63 }
  0xf8   : > { %v615_v16 = vpop.permute.xlu0 %614  ;;  %v1289_v23 = vrot.slane %v1281_v40, %v4610_v7  ;;  %v627_v24 = vpop.permute.xlu1 %626  ;;  %v1296_v15 = vrot.slane %v1282_v4, %v4610_v7  ;;  %v779_v2 = vsel %vm759_vm3, %v750_v37, %v565_v20  ;;  %v1717_v40 = vrot.slane %v3897_v55, %v4610_v7 }
  0xf9   : > { %v825_v39 = vsel %vm817_vm5, %v796_v54, %v615_v16  ;;  %v808_v22 = vsel %vm788_vm4, %v779_v2, %v594_v29 }
  0xfa   : > { %622 = vrot.lane.b32.xlu0 %v4434_v36, %s4229_s21  ;;  %657 = vrot.lane.b32.xlu1 %v4463_v48, %s4233_s11  ;;  %v1297_v38 = vcombine.high %v1289_v23, %v1289_v23  ;;  %v1032_v36 = vrot.slane %v1004_v30, %v4610_v7  ;;  %v1298_v45 = vcombine.high %v1296_v15, %v1296_v15 }
  0xfb   : > { %v837_v43 = vsel %vm817_vm5, %v808_v22, %v627_v24  ;;  %v1305_v33 = vrot.slane %v1289_v23, %v4610_v7  ;;  %v1312_v62 = vrot.slane %v1296_v15, %v4610_v7 }
  0xfc   : > { %v457_v35 = vpop.permute.xlu0 %456  ;;  %v650_v14 = vpop.permute.xlu1 %649  ;;  %v1319_v52 = vrot.slane %v1297_v38, %v4610_v7  ;;  %v1708_v0 = vcombine.low %v1018_v63, %v1032_v36  ;;  %v1326_v28 = vrot.slane %v1298_v45, %v4610_v7 }
  0xfd   : > { %v4793_v48 = vsel %vm846_vm6, %v825_v39, %v650_v14  ;;  %v1328_v16 = vcombine.high %v1312_v62, %v1312_v62 }
  0xfe   : > { %v1036_v42 = vcombine.low %v4793_v48, %v4545_v13  ;;  %v2037_v9 = vcombine.low %v1305_v33, %v1319_v52  ;;  %v3900_v12 = vcombine.high %v1305_v33, %v1319_v52  ;;  %v1724_v41 = vrot.slane %v1708_v0, %v4610_v7 }
  0xff   : > { %v2039_v24 = vcombine.low %v1312_v62, %v1326_v28 }
 0x100   : > { %v662_v47 = vpop.permute.xlu0 %661  ;;  %v1044_v3 = vrot.slane %v1036_v42, %v4610_v7  ;;  %v499_v53 = vpop.permute.xlu1 %498  ;;  %v2047_v58 = vrot.slane %v2037_v9, %v4610_v7  ;;  %v2054_v54 = vrot.slane %v3900_v12, %v4610_v7  ;;  %v1740_v37 = vcombine.high %v1717_v40, %v1724_v41 }
 0x101   : > { %v866_v20 = vsel %vm846_vm6, %v837_v43, %v662_v47  ;;  %v1739_v38 = vcombine.low %v1717_v40, %v1724_v41  ;;  %v2061_v63 = vrot.slane %v2039_v24, %v4610_v7  ;;  %v694_v47 = vsel %vm672_vm0, %v4476_v51, %v457_v35 }
 0x102   : > { %v1330_v6 = vcombine.low %v866_v20, %v4536_v8  ;;  %v1052_v1 = vcombine.high %v1044_v3, %v1044_v3  ;;  %v1060_v5 = vrot.slane %v1044_v3, %v4610_v7  ;;  %v1331_v22 = vcombine.high %v866_v20, %v4536_v8 }
 0x103   : > { %v2070_v43 = vcombine.high %v2047_v58, %v2054_v54  ;;  %v1756_v52 = vrot.slane %v1740_v37, %v4610_v7  ;;  %v1749_v55 = vrot.slane %v1739_v38, %v4610_v7  ;;  %v2069_v33 = vcombine.low %v2047_v58, %v2054_v54 }
 0x104   : > { %v1338_v29 = vrot.slane %v1330_v6, %v4610_v7  ;;  %v4811_v49 = vpop.permute.xlu0 %444  ;;  %v4814_v11 = vrot.slane %v1052_v1, %v4610_v7  ;;  %v1082_v26 = vcombine.high %v1060_v5, %v1060_v5  ;;  %v532_v56 = vpop.permute.xlu1 %531  ;;  %v1709_v4 = vcombine.low %v1034_v10, %v1060_v5 }
 0x105   : > { %v723_v20 = vsel %vm701_vm1, %v694_v47, %v499_v53  ;;  %v1345_v10 = vrot.slane %v1331_v22, %v4610_v7  ;;  %v2086_v28 = vrot.slane %v2070_v43, %v4610_v7  ;;  %v1037_v9 = vcombine.high %v4793_v48, %v4545_v13 }
 0x106   : > { %v1710_v17 = vcombine.low %v4814_v11, %v1082_v26  ;;  %v4820_v23 = vrot.slane %v1338_v29, %v4610_v7  ;;  %v1731_v15 = vrot.slane %v1709_v4, %v4610_v7  ;;  %v1346_v39 = vcombine.high %v1338_v29, %v1338_v29 }
 0x107   : > { %v752_v12 = vsel %vm730_vm2, %v723_v20, %v532_v56  ;;  %v2079_v53 = vrot.slane %v2069_v33, %v4610_v7  ;;  %v1361_v13 = vrot.slane %v1345_v10, %v4610_v7  ;;  %v682_v37 = vsel %vm672_vm0, %v4412_v27, %v4811_v49 }
 0x108   : > { %v4822_v30 = vpop.permute.xlu0 %486  ;;  %v1738_v19 = vrot.slane %v1710_v17, %v4610_v7  ;;  %v2040_v32 = vcombine.low %v1328_v16, %v4820_v23  ;;  %v567_v18 = vpop.permute.xlu1 %566  ;;  %v1368_v62 = vrot.slane %v1346_v39, %v4610_v7  ;;  %v1084_v49 = vcombine.high %v4814_v11, %v4814_v11 }
 0x109   : > { %v781_v40 = vsel %vm759_vm3, %v752_v12, %v567_v18  ;;  %v1376_v18 = vcombine.high %v4820_v23, %v4820_v23 }
 0x10a   : > { %v1742_v36 = vcombine.high %v1731_v15, %v1738_v19  ;;  %v1741_v2 = vcombine.low %v1731_v15, %v1738_v19  ;;  %v2068_v45 = vrot.slane %v2040_v32, %v4610_v7  ;;  %v1378_v4 = vcombine.high %v1368_v62, %v1368_v62 }
 0x10b   : > { %v1347_v19 = vcombine.high %v1345_v10, %v1345_v10  ;;  %v1051_v32 = vrot.slane %v1037_v9, %v4610_v7 }
 0x10c   : > { %v520_v14 = vpop.permute.xlu0 %519  ;;  %v596_v42 = vpop.permute.xlu1 %595  ;;  %v1770_v3 = vrot.slane %v1742_v36, %v4610_v7  ;;  %v1763_v0 = vrot.slane %v1741_v2, %v4610_v7  ;;  %v2072_v6 = vcombine.high %v2061_v63, %v2068_v45  ;;  %v2071_v8 = vcombine.low %v2061_v63, %v2068_v45 }
 0x10d   : > { %v810_v16 = vsel %vm788_vm4, %v781_v40, %v596_v42  ;;  %v2104_v15 = vcombine.low %v1378_v4, %v1361_v13  ;;  %v1375_v39 = vrot.slane %v1347_v19, %v4610_v7  ;;  %v1377_v36 = vcombine.high %v1361_v13, %v1361_v13 }
 0x10e   : > { %v1772_v1 = vcombine.low %v1756_v52, %v1770_v3  ;;  %v1771_v35 = vcombine.low %v1749_v55, %v1763_v0  ;;  %v2100_v29 = vrot.slane %v2072_v6, %v4610_v7  ;;  %v2093_v26 = vrot.slane %v2071_v8, %v4610_v7 }
 0x10f   : > { %v711_v2 = vsel %vm701_vm1, %v682_v37, %v4822_v30  ;;  %v1053_v42 = vcombine.high %v1051_v32, %v1051_v32  ;;  %v1067_v63 = vrot.slane %v1051_v32, %v4610_v7  ;;  %v2103_v45 = vcombine.low %v1368_v62, %v1376_v18 }
 0x110   : > { %v555_v5 = vpop.permute.xlu0 %554  ;;  %v629_v51 = vpop.permute.xlu1 %628  ;;  %3915 = vmatprep.mubr.msk.bf16.mxu0 %vm672_vm0, %v1772_v1  ;;  %v2102_v41 = vcombine.low %v2086_v28, %v2100_v29  ;;  %v2101_v17 = vcombine.low %v2079_v53, %v2093_v26  ;;  %v740_v43 = vsel %vm730_vm2, %v711_v2, %v520_v14  ;;  %v2120_v52 = vrot.slane %v2104_v15, %v4610_v7 }
 0x111   : > { %2575 = vmatmul.mubr.bf16.gmra.mxu0 %v1771_v35  ;;  %v839_v48 = vsel %vm817_vm5, %v810_v16, %v629_v51  ;;  %v769_v47 = vsel %vm759_vm3, %v740_v43, %v555_v5  ;;  %v2105_v55 = vcombine.low %v1375_v39, %v1377_v36  ;;  %v1081_v8 = vrot.slane %v1053_v42, %v4610_v7 }
 0x112   : > { %3920 = vmatprep.mubr.msk.bf16.mxu1 %vm672_vm0, %v2102_v41  ;;  %v1083_v20 = vcombine.high %v1067_v63, %v1067_v63  ;;  %v2113_v11 = vrot.slane %v2103_v45, %v4610_v7  ;;  %v1773_v10 = vcombine.low %v1084_v49, %v1067_v63 }
 0x113   : > { %2615 = vmatmul.mubr.bf16.vlgmr.msra.gmra.mxu1 %v2101_v17  ;;  %v2127_v29 = vrot.slane %v2105_v55, %v4610_v7 }
 0x114   : > { %v584_v24 = vpop.permute.xlu0 %583  ;;  %v664_v56 = vpop.permute.xlu1 %663  ;;  %v2136_v35 = vcombine.high %v2113_v11, %v2120_v52  ;;  %v2135_v28 = vcombine.low %v2113_v11, %v2120_v52  ;;  %v1774_v26 = vcombine.low %v1081_v8, %v1083_v20  ;;  %v1783_v16 = vrot.slane %v1773_v10, %v4610_v7 }
 0x115   : > { %v4858_v58 = vsel %vm846_vm6, %v839_v48, %v664_v56  ;;  %v798_v30 = vsel %vm788_vm4, %v769_v47, %v584_v24 }
 0x116   : > { %v1379_v54 = vcombine.low %v4858_v58, %v4580_v34  ;;  %v2152_v24 = vrot.slane %v2136_v35, %v4610_v7  ;;  %v2145_v19 = vrot.slane %v2135_v28, %v4610_v7  ;;  %v1380_v15 = vcombine.high %v4858_v58, %v4580_v34 }
 0x118   : > { %v617_v38 = vpop.permute.xlu0 %616  ;;  %v1387_v23 = vrot.slane %v1379_v54, %v4610_v7  ;;  %v4869_v22 = vpop.permute.xlu1 %446  ;;  %v1790_v54 = vrot.slane %v1774_v26, %v4610_v7  ;;  %v1394_v47 = vrot.slane %v1380_v15, %v4610_v7 }
 0x119   : > { %v827_v14 = vsel %vm817_vm5, %v798_v30, %v617_v38  ;;  %v684_v20 = vsel %vm672_vm0, %v4499_v57, %v4869_v22 }
 0x11a   : > { %v1395_v27 = vcombine.high %v1387_v23, %v1387_v23  ;;  %v4881_v0 = vrot.slane %v1387_v23, %v4610_v7  ;;  %v1806_v45 = vcombine.high %v1783_v16, %v1790_v54  ;;  %v1805_v43 = vcombine.low %v1783_v16, %v1790_v54 }
 0x11b   : > { %v1396_v8 = vcombine.high %v1394_v47, %v1394_v47 }
 0x11c   : > { %v4878_v3 = vpop.permute.xlu0 %458  ;;  %v4884_v6 = vrot.slane %v1395_v27, %v4610_v7  ;;  %v652_v33 = vpop.permute.xlu1 %651  ;;  %v1822_v30 = vrot.slane %v1806_v45, %v4610_v7 }
 0x11d   : > { %v856_v62 = vsel %vm846_vm6, %v827_v14, %v652_v33  ;;  %v1815_v14 = vrot.slane %v1805_v43, %v4610_v7 }
 0x11e   : > { %v2106_v1 = vcombine.low %v4881_v0, %v4884_v6  ;;  %v1085_v5 = vcombine.low %v856_v62, %v4575_v31  ;;  %v1086_v34 = vcombine.high %v856_v62, %v4575_v31  ;;  %v696_v31 = vsel %vm672_vm0, %v4510_v60, %v4878_v3 }
 0x120   : > { %v489_v51 = vpop.permute.xlu0 %488  ;;  %v2134_v9 = vrot.slane %v2106_v1, %v4610_v7  ;;  %v1093_v12 = vrot.slane %v1085_v5, %v4610_v7  ;;  %v501_v53 = vpop.permute.xlu1 %500  ;;  %v1100_v5 = vrot.slane %v1086_v34, %v4610_v7 }
 0x121   : > { %v713_v62 = vsel %vm701_vm1, %v684_v20, %v489_v51  ;;  %v725_v35 = vsel %vm701_vm1, %v696_v31, %v501_v53 }
 0x122   : > { %v1101_v40 = vcombine.high %v1093_v12, %v1093_v12  ;;  %v2138_v41 = vcombine.high %v2127_v29, %v2134_v9  ;;  %v2137_v4 = vcombine.low %v2127_v29, %v2134_v9  ;;  %v1109_v13 = vrot.slane %v1093_v12, %v4610_v7 }
 0x123   : > { %v1424_v9 = vrot.slane %v1396_v8, %v4610_v7  ;;  %v1102_v3 = vcombine.high %v1100_v5, %v1100_v5 }
 0x124   : > { %v522_v17 = vpop.permute.xlu0 %521  ;;  %v1123_v48 = vrot.slane %v1101_v40, %v4610_v7  ;;  %v534_v56 = vpop.permute.xlu1 %533  ;;  %v2166_v32 = vrot.slane %v2138_v41, %v4610_v7  ;;  %v2159_v18 = vrot.slane %v2137_v4, %v4610_v7  ;;  %v1410_v40 = vrot.slane %v1394_v47, %v4610_v7 }
 0x125   : > { %v742_v28 = vsel %vm730_vm2, %v713_v62, %v522_v17  ;;  %v754_v57 = vsel %vm730_vm2, %v725_v35, %v534_v56 }
 0x126   : > { %v1775_v37 = vcombine.low %v1109_v13, %v1123_v48  ;;  %v3898_v38 = vcombine.high %v1109_v13, %v1123_v48  ;;  %v2168_v39 = vcombine.low %v2152_v24, %v2166_v32  ;;  %v2167_v36 = vcombine.low %v2145_v19, %v2159_v18 }
 0x127   : > { %v3901_v13 = vcombine.high %v4881_v0, %v4884_v6  ;;  %v2170_v48 = vcombine.low %v1410_v40, %v1424_v9  ;;  %v1116_v32 = vrot.slane %v1100_v5, %v4610_v7  ;;  %v1130_v18 = vrot.slane %v1102_v3, %v4610_v7 }
 0x128   : > { %v557_v2 = vpop.permute.xlu0 %556  ;;  %v1797_v23 = vrot.slane %v1775_v37, %v4610_v7  ;;  %v1804_v42 = vrot.slane %v3898_v38, %v4610_v7  ;;  %v569_v63 = vpop.permute.xlu1 %568  ;;  %3921 = vmatprep.mubr.msk.bf16.mxu1 %vm672_vm0, %v2168_v39  ;;  %v1426_v39 = vcombine.high %v1410_v40, %v1410_v40 }
 0x129   : > { %2623 = vmatmul.mubr.bf16.gmra.mxu1 %v2167_v36  ;;  %v771_v22 = vsel %vm759_vm3, %v742_v28, %v557_v2  ;;  %v783_v12 = vsel %vm759_vm3, %v754_v57, %v569_v63  ;;  %v2179_v36 = vrot.slane %v3901_v13, %v4610_v7  ;;  %v2186_v2 = vrot.slane %v2170_v48, %v4610_v7 }
 0x12a   : > { %v1808_v27 = vcombine.high %v1797_v23, %v1804_v42  ;;  %v1807_v49 = vcombine.low %v1797_v23, %v1804_v42  ;;  %v1132_v63 = vcombine.high %v1116_v32, %v1116_v32  ;;  %v1839_v45 = vcombine.low %v1116_v32, %v1130_v18 }
 0x12b   : > { %v2202_v31 = vcombine.high %v2179_v36, %v2186_v2  ;;  %v2201_v28 = vcombine.low %v2179_v36, %v2186_v2 }
 0x12c   : > { %v586_v58 = vpop.permute.xlu0 %585  ;;  %v598_v52 = vpop.permute.xlu1 %597  ;;  %v1836_v55 = vrot.slane %v1808_v27, %v4610_v7  ;;  %v1829_v33 = vrot.slane %v1807_v49, %v4610_v7  ;;  %v1849_v20 = vrot.slane %v1839_v45, %v4610_v7 }
 0x12d   : > { %v800_v60 = vsel %vm788_vm4, %v771_v22, %v586_v58  ;;  %v812_v51 = vsel %vm788_vm4, %v783_v12, %v598_v52  ;;  %v2211_v40 = vrot.slane %v2201_v28, %v4610_v7 }
 0x12e   : > { %v1838_v11 = vcombine.low %v1822_v30, %v1836_v55  ;;  %v1837_v1 = vcombine.low %v1815_v14, %v1829_v33 }
 0x130   : > { %v619_v10 = vpop.permute.xlu0 %618  ;;  %v631_v29 = vpop.permute.xlu1 %630  ;;  %3916 = vmatprep.mubr.msk.bf16.mxu0 %vm672_vm0, %v1838_v11 }
 0x131   : > { %2583 = vmatmul.mubr.bf16.gmra.mxu0 %v1837_v1  ;;  %v829_v53 = vsel %vm817_vm5, %v800_v60, %v619_v10  ;;  %v841_v41 = vsel %vm817_vm5, %v812_v51, %v631_v29  ;;  %v2218_v60 = vrot.slane %v2202_v31, %v4610_v7 }
 0x134   : > { %v654_v26 = vpop.permute.xlu0 %653  ;;  %v666_v4 = vpop.permute.xlu1 %665 }
 0x135   : > { %v858_v16 = vsel %vm846_vm6, %v829_v53, %v654_v26  ;;  %v4937_v17 = vsel %vm846_vm6, %v841_v41, %v666_v4 }
 0x136   : > { %v1134_v24 = vcombine.low %v858_v16, %v4673_v21  ;;  %v1135_v19 = vcombine.high %v858_v16, %v4673_v21  ;;  %v1428_v56 = vcombine.low %v4937_v17, %v4649_v59  ;;  %v1429_v16 = vcombine.high %v4937_v17, %v4649_v59 }
 0x138   : > { %v1142_v54 = vrot.slane %v1134_v24, %v4610_v7  ;;  %v461_v15 = vpop.permute.xlu0 %460  ;;  %v1436_v37 = vrot.slane %v1428_v56, %v4610_v7  ;;  %v4950_v38 = vrot.slane %v1135_v19, %v4610_v7  ;;  %v4952_v21 = vpop.permute.xlu1 %502  ;;  %v1443_v17 = vrot.slane %v1429_v16, %v4610_v7 }
 0x13a   : > { %v1150_v0 = vcombine.high %v1142_v54, %v1142_v54  ;;  %v1158_v6 = vrot.slane %v1142_v54, %v4610_v7  ;;  %v1444_v23 = vcombine.high %v1436_v37, %v1436_v37  ;;  %v1452_v42 = vrot.slane %v1436_v37, %v4610_v7 }
 0x13b   : > { %v4966_v58 = vrot.slane %v4950_v38, %v4610_v7 }
 0x13c   : > { %v1172_v43 = vrot.slane %v1150_v0, %v4610_v7  ;;  %v1180_v47 = vcombine.high %v1158_v6, %v1158_v6  ;;  %v4959_v27 = vpop.permute.xlu0 %448  ;;  %v4962_v49 = vrot.slane %v1444_v23, %v4610_v7  ;;  %v1474_v34 = vcombine.high %v1452_v42, %v1452_v42  ;;  %v536_v52 = vpop.permute.xlu1 %535 }
 0x13d   : > { %v2171_v30 = vcombine.low %v1426_v39, %v1452_v42  ;;  %v1840_v14 = vcombine.low %v1132_v63, %v1158_v6  ;;  %v4108_v39 = vld [vmem:[%s4352_s8 + $0x60] sm:$0xff]   ;;  %v1459_v63 = vrot.slane %v1443_v17, %v4610_v7 }
 0x13e   : > { %v1182_v55 = vcombine.high %v1172_v43, %v1172_v43  ;;  %v1841_v33 = vcombine.low %v1172_v43, %v1180_v47  ;;  %v2172_v8 = vcombine.low %v4962_v49, %v1474_v34  ;;  %v698_v0 = vsel %vm672_vm0, %v4108_v39, %v461_v15 }
 0x13f   : > { %v1856_v1 = vrot.slane %v1840_v14, %v4610_v7  ;;  %v2193_v62 = vrot.slane %v2171_v30, %v4610_v7  ;;  %v727_v36 = vsel %vm701_vm1, %v698_v0, %v4952_v21  ;;  %v1445_v15 = vcombine.high %v1443_v17, %v1443_v17 }
 0x140   : > { %v1842_v11 = vcombine.low %v1182_v55, %v4966_v58  ;;  %v491_v5 = vpop.permute.xlu0 %490  ;;  %v2200_v10 = vrot.slane %v2172_v8, %v4610_v7  ;;  %v571_v35 = vpop.permute.xlu1 %570  ;;  %v1863_v29 = vrot.slane %v1841_v33, %v4610_v7  ;;  %v756_v23 = vsel %vm730_vm2, %v727_v36, %v536_v52 }
 0x141   : > { %v1872_v22 = vcombine.high %v1849_v20, %v1856_v1  ;;  %v1871_v41 = vcombine.low %v1849_v20, %v1856_v1  ;;  %v785_v45 = vsel %vm759_vm3, %v756_v23, %v571_v35  ;;  %v1476_v47 = vcombine.high %v4962_v49, %v4962_v49  ;;  %v4109_v20 = vld [vmem:[%s4352_s8 + $0x30] sm:$0xff]  }
 0x142   : > { %v1870_v57 = vrot.slane %v1842_v11, %v4610_v7  ;;  %v2204_v9 = vcombine.high %v2193_v62, %v2200_v10  ;;  %v2203_v3 = vcombine.low %v2193_v62, %v2200_v10  ;;  %v1473_v52 = vrot.slane %v1445_v15, %v4610_v7 }
 0x143   : > { %v1888_v19 = vrot.slane %v1872_v22, %v4610_v7  ;;  %v1881_v56 = vrot.slane %v1871_v41, %v4610_v7  ;;  %v1475_v14 = vcombine.high %v1459_v63, %v1459_v63  ;;  %v2235_v8 = vcombine.low %v1476_v47, %v1459_v63 }
 0x144   : > { %v524_v12 = vpop.permute.xlu0 %523  ;;  %v1874_v51 = vcombine.high %v1863_v29, %v1870_v57  ;;  %v600_v53 = vpop.permute.xlu1 %599  ;;  %v2232_v26 = vrot.slane %v2204_v9, %v4610_v7  ;;  %v1873_v4 = vcombine.low %v1863_v29, %v1870_v57  ;;  %v2225_v24 = vrot.slane %v2203_v3, %v4610_v7 }
 0x145   : > { %v814_v43 = vsel %vm788_vm4, %v785_v45, %v600_v53  ;;  %v686_v11 = vsel %vm672_vm0, %v4109_v20, %v4959_v27  ;;  %v2236_v10 = vcombine.low %v1473_v52, %v1475_v14  ;;  %v1151_v29 = vcombine.high %v4950_v38, %v4950_v38 }
 0x146   : > { %v1902_v13 = vrot.slane %v1874_v51, %v4610_v7  ;;  %v2234_v48 = vcombine.low %v2218_v60, %v2232_v26  ;;  %v1895_v32 = vrot.slane %v1873_v4, %v4610_v7  ;;  %v2233_v54 = vcombine.low %v2211_v40, %v2225_v24 }
 0x147   : > { %v715_v31 = vsel %vm701_vm1, %v686_v11, %v491_v5  ;;  %v2245_v22 = vrot.slane %v2235_v8, %v4610_v7  ;;  %v1179_v40 = vrot.slane %v1151_v29, %v4610_v7  ;;  %v1181_v41 = vcombine.high %v4966_v58, %v4966_v58  ;;  %v4111_v29 = vld [vmem:[%s4352_s8 + $0x38] sm:$0xff]  }
 0x148   : > { %v559_v18 = vpop.permute.xlu0 %558  ;;  %v1904_v37 = vcombine.low %v1888_v19, %v1902_v13  ;;  %v633_v6 = vpop.permute.xlu1 %632  ;;  %3922 = vmatprep.mubr.msk.bf16.mxu1 %vm672_vm0, %v2234_v48  ;;  %v1903_v59 = vcombine.low %v1881_v56, %v1895_v32  ;;  %v744_v35 = vsel %vm730_vm2, %v715_v31, %v524_v12  ;;  %v2252_v12 = vrot.slane %v2236_v10, %v4610_v7 }
 0x149   : > { %2631 = vmatmul.mubr.bf16.gmra.mxu1 %v2233_v54  ;;  %v843_v34 = vsel %vm817_vm5, %v814_v43, %v633_v6  ;;  %v773_v57 = vsel %vm759_vm3, %v744_v35, %v559_v18  ;;  %v1905_v0 = vcombine.low %v1179_v40, %v1181_v41 }
 0x14a   : > { %3917 = vmatprep.mubr.msk.bf16.mxu0 %vm672_vm0, %v1904_v37  ;;  %v2268_v48 = vcombine.high %v2245_v22, %v2252_v12  ;;  %v2267_v56 = vcombine.low %v2245_v22, %v2252_v12  ;;  %v671_v22 = vrot.slane %v4733_v25, 1 }
 0x14b   : > { %2591 = vmatmul.mubr.bf16.gmra.mxu0 %v1903_v59  ;;  %v1915_v20 = vrot.slane %v1905_v0, %v4610_v7 }
 0x14c   : > { %v4993_v2 = vpop.permute.xlu0 %462  ;;  %v588_v42 = vpop.permute.xlu1 %587  ;;  %v2284_v17 = vrot.slane %v2268_v48, %v4610_v7  ;;  %v2277_v23 = vrot.slane %v2267_v56, %v4610_v7 }
 0x14d   : > { %v802_v27 = vsel %vm788_vm4, %v773_v57, %v588_v42 }
 0x150   : > { %v668_v30 = vpop.permute.xlu0 %667  ;;  %v5002_v21 = vpop.permute.xlu1 %504 }
 0x151   : > { %v872_v55 = vsel %vm846_vm6, %v843_v34, %v668_v30 }
 0x152   : > { %v1477_v33 = vcombine.low %v872_v55, %v4740_v46  ;;  %v1478_v37 = vcombine.high %v872_v55, %v4740_v46  ;;  %v4110_v55 = vld [vmem:[%s4352_s8 + $0x68] sm:$0xff]  }
 0x153   : > { %v700_v52 = vsel %vm672_vm0, %v4110_v55, %v4993_v2 }
 0x154   : > { %v1485_v1 = vrot.slane %v1477_v33, %v4610_v7  ;;  %v621_v49 = vpop.permute.xlu0 %620  ;;  %v5012_v62 = vpop.permute.xlu1 %450  ;;  %v1492_v47 = vrot.slane %v1478_v37, %v4610_v7  ;;  %v729_v11 = vsel %vm701_vm1, %v700_v52, %v5002_v21 }
 0x155   : > { %v831_v3 = vsel %vm817_vm5, %v802_v27, %v621_v49  ;;  %v688_v57 = vsel %vm672_vm0, %v4111_v29, %v5012_v62 }
 0x156   : > { %v1493_v28 = vcombine.high %v1485_v1, %v1485_v1  ;;  %v1501_v9 = vrot.slane %v1485_v1, %v4610_v7  ;;  %v1508_v56 = vrot.slane %v1492_v47, %v4610_v7 }
 0x158   : > { %v1515_v60 = vrot.slane %v1493_v28, %v4610_v7  ;;  %v538_v5 = vpop.permute.xlu0 %537  ;;  %v656_v51 = vpop.permute.xlu1 %655  ;;  %v1494_v28 = vcombine.high %v1492_v47, %v1492_v47 }
 0x159   : > { %v860_v38 = vsel %vm846_vm6, %v831_v3, %v656_v51  ;;  %v758_v2 = vsel %vm730_vm2, %v729_v11, %v538_v5 }
 0x15a   : > { %v2237_v53 = vcombine.low %v1501_v9, %v1515_v60  ;;  %v3902_v26 = vcombine.high %v1501_v9, %v1515_v60  ;;  %v1183_v4 = vcombine.low %v860_v38, %v4454_v44  ;;  %v1184_v16 = vcombine.high %v860_v38, %v4454_v44 }
 0x15b   : > { %v1522_v25 = vrot.slane %v1494_v28, %v4610_v7 }
 0x15c   : > { %v2259_v24 = vrot.slane %v2237_v53, %v4610_v7  ;;  %v2266_v19 = vrot.slane %v3902_v26, %v4610_v7  ;;  %v493_v13 = vpop.permute.xlu0 %492  ;;  %v1191_v32 = vrot.slane %v1183_v4, %v4610_v7  ;;  %v1198_v18 = vrot.slane %v1184_v16, %v4610_v7  ;;  %v573_v54 = vpop.permute.xlu1 %572 }
 0x15d   : > { %v787_v21 = vsel %vm759_vm3, %v758_v2, %v573_v54  ;;  %v717_v51 = vsel %vm701_vm1, %v688_v57, %v493_v13 }
 0x15e   : > { %v2270_v39 = vcombine.high %v2259_v24, %v2266_v19  ;;  %v2269_v58 = vcombine.low %v2259_v24, %v2266_v19  ;;  %v1199_v6 = vcombine.high %v1191_v32, %v1191_v32  ;;  %v1200_v44 = vcombine.high %v1198_v18, %v1198_v18 }
 0x15f   : > { %v1207_v15 = vrot.slane %v1191_v32, %v4610_v7  ;;  %v5041_v63 = vrot.slane %v1198_v18, %v4610_v7 }
 0x160   : > { %v526_v59 = vpop.permute.xlu0 %525  ;;  %v2298_v36 = vrot.slane %v2270_v39, %v4610_v7  ;;  %v2291_v42 = vrot.slane %v2269_v58, %v4610_v7  ;;  %v1221_v46 = vrot.slane %v1199_v6, %v4610_v7  ;;  %v1228_v45 = vrot.slane %v1200_v44, %v4610_v7  ;;  %v602_v43 = vpop.permute.xlu1 %601 }
 0x161   : > { %v816_v12 = vsel %vm788_vm4, %v787_v21, %v602_v43  ;;  %v746_v41 = vsel %vm730_vm2, %v717_v51, %v526_v59  ;;  %v2301_v6 = vcombine.low %v1508_v56, %v1522_v25 }
 0x162   : > { %v2300_v34 = vcombine.low %v2284_v17, %v2298_v36  ;;  %v2299_v30 = vcombine.low %v2277_v23, %v2291_v42  ;;  %v1906_v14 = vcombine.low %v1207_v15, %v1221_v46  ;;  %v3899_v33 = vcombine.high %v1207_v15, %v1221_v46 }
 0x163   : > { %v1908_v8 = vcombine.low %v5041_v63, %v1228_v45  ;;  %v1524_v42 = vcombine.high %v1508_v56, %v1508_v56 }
 0x164   : > { %3923 = vmatprep.mubr.msk.bf16.mxu1 %vm672_vm0, %v2300_v34  ;;  %v561_v1 = vpop.permute.xlu0 %560  ;;  %v1922_v49 = vrot.slane %v1906_v14, %v4610_v7  ;;  %v1929_v31 = vrot.slane %v3899_v33, %v4610_v7  ;;  %v635_v35 = vpop.permute.xlu1 %634  ;;  %v1230_v33 = vcombine.high %v5041_v63, %v5041_v63 }
 0x165   : > { %v1936_v10 = vrot.slane %v1908_v8, %v4610_v7  ;;  %2639 = vmatmul.mubr.bf16.gmra.mxu1 %v2299_v30  ;;  %v845_v53 = vsel %vm817_vm5, %v816_v12, %v635_v35  ;;  %v775_v24 = vsel %vm759_vm3, %v746_v41, %v561_v1  ;;  %v2311_v30 = vrot.slane %v2301_v6, %v4610_v7 }
 0x166   : > { %v1938_v27 = vcombine.high %v1915_v20, %v1922_v49  ;;  %v1937_v60 = vcombine.low %v1915_v20, %v1922_v49 }
 0x167   : > { %v1940_v9 = vcombine.high %v1929_v31, %v1936_v10  ;;  %v1939_v3 = vcombine.low %v1929_v31, %v1936_v10 }
 0x168   : > { %v590_v5 = vpop.permute.xlu0 %589  ;;  %v670_v26 = vpop.permute.xlu1 %669  ;;  %v1954_v38 = vrot.slane %v1938_v27, %v4610_v7  ;;  %v1947_v40 = vrot.slane %v1937_v60, %v4610_v7 }
 0x169   : > { %v1968_v62 = vrot.slane %v1940_v9, %v4610_v7  ;;  %v874_v4 = vsel %vm846_vm6, %v845_v53, %v670_v26  ;;  %v1961_v16 = vrot.slane %v1939_v3, %v4610_v7  ;;  %v804_v32 = vsel %vm788_vm4, %v775_v24, %v590_v5 }
 0x16a   : > { %v1526_v19 = vcombine.low %v874_v4, %v671_v22  ;;  %v1527_v13 = vcombine.high %v874_v4, %v671_v22 }
 0x16b   : > { %v1970_v48 = vcombine.low %v1954_v38, %v1968_v62  ;;  %v1969_v54 = vcombine.low %v1947_v40, %v1961_v16 }
 0x16c   : > { %v623_v18 = vpop.permute.xlu0 %622  ;;  %v1534_v37 = vrot.slane %v1526_v19, %v4610_v7  ;;  %v1541_v39 = vrot.slane %v1527_v13, %v4610_v7  ;;  %v658_v0 = vpop.permute.xlu1 %657 }
 0x16d   : > { %3918 = vmatprep.mubr.msk.bf16.mxu0 %vm672_vm0, %v1970_v48  ;;  %v833_v58 = vsel %vm817_vm5, %v804_v32, %v623_v18 }
 0x16e   : > { %v862_v44 = vsel %vm846_vm6, %v833_v58, %v658_v0  ;;  %2599 = vmatmul.mubr.bf16.gmra.mxu0 %v1969_v54  ;;  %v1542_v59 = vcombine.high %v1534_v37, %v1534_v37  ;;  %v1543_v17 = vcombine.high %v1541_v39, %v1541_v39  ;;  %v1550_v36 = vrot.slane %v1534_v37, %v4610_v7 }
 0x16f   : > { %v1557_v23 = vrot.slane %v1541_v39, %v4610_v7  ;;  %v1232_v15 = vcombine.low %v862_v44, %v4473_v50  ;;  %v1233_v46 = vcombine.high %v862_v44, %v4473_v50 }
 0x170   : > { %v1564_v45 = vrot.slane %v1542_v59, %v4610_v7  ;;  %v1571_v43 = vrot.slane %v1543_v17, %v4610_v7  ;;  %v1572_v47 = vcombine.high %v1550_v36, %v1550_v36  ;;  %v2302_v55 = vcombine.low %v1524_v42, %v1550_v36 }
 0x171   : > { %v1573_v34 = vcombine.high %v1557_v23, %v1557_v23  ;;  %v1240_v52 = vrot.slane %v1232_v15, %v4610_v7  ;;  %v1247_v14 = vrot.slane %v1233_v46, %v4610_v7  ;;  %v5122_v46 = vld [vmem:[%s5322_s2] ss:$0 sm:$0xff] }
 0x172   : > { %v1574_v8 = vcombine.high %v1564_v45, %v1564_v45  ;;  %v2303_v20 = vcombine.low %v1564_v45, %v1572_v47  ;;  %v2318_v50 = vrot.slane %v2302_v55, %v4610_v7 }
 0x173   : > { %v2367_v11 = vcombine.low %v1571_v43, %v1573_v34  ;;  %v1248_v1 = vcombine.high %v1240_v52, %v1240_v52  ;;  %v1249_v49 = vcombine.high %v1247_v14, %v1247_v14  ;;  %v1256_v31 = vrot.slane %v1240_v52, %v4610_v7 }
 0x174   : > { %v2304_v10 = vcombine.low %v1574_v8, %v1557_v23  ;;  %v2325_v2 = vrot.slane %v2303_v20, %v4610_v7  ;;  %v1263_v35 = vrot.slane %v1247_v14, %v4610_v7  ;;  %v2334_v9 = vcombine.high %v2311_v30, %v2318_v50 }
 0x175   : > { %v2374_v28 = vrot.slane %v2367_v11, %v4610_v7  ;;  %v1270_v29 = vrot.slane %v1248_v1, %v4610_v7  ;;  %v1277_v63 = vrot.slane %v1249_v49, %v4610_v7  ;;  %v1278_v57 = vcombine.high %v1256_v31, %v1256_v31 }
 0x176   : > { %v1971_v21 = vcombine.low %v1230_v33, %v1256_v31  ;;  %v2332_v22 = vrot.slane %v2304_v10, %v4610_v7  ;;  %v1279_v27 = vcombine.high %v1263_v35, %v1263_v35  ;;  %v2333_v60 = vcombine.low %v2311_v30, %v2318_v50 }
 0x177   : > { %v1280_v3 = vcombine.high %v1270_v29, %v1270_v29  ;;  %v1972_v51 = vcombine.low %v1270_v29, %v1278_v57  ;;  %v2375_v12 = vcombine.high %v2374_v28, %v2374_v28  ;;  %v2350_v25 = vrot.slane %v2334_v9, %v4610_v7 }
 0x178   : > { %v1974_v5 = vcombine.low %v1277_v63, %v1279_v27  ;;  %v2336_v53 = vcombine.high %v2325_v2, %v2332_v22  ;;  %v2335_v26 = vcombine.low %v2325_v2, %v2332_v22  ;;  %v1981_v62 = vrot.slane %v1971_v21, %v4610_v7 }
 0x179   : > { %v1973_v38 = vcombine.low %v1280_v3, %v1263_v35  ;;  %v1988_v40 = vrot.slane %v1972_v51, %v4610_v7  ;;  %v2343_v4 = vrot.slane %v2333_v60, %v4610_v7  ;;  %v2389_v24 = vrot.slane %v2375_v12, %v4610_v7 }
 0x17a   : > { %v2364_v41 = vrot.slane %v2336_v53, %v4610_v7  ;;  %v2357_v16 = vrot.slane %v2335_v26, %v4610_v7  ;;  %v2002_v13 = vrot.slane %v1974_v5, %v4610_v7  ;;  %v2382_v36 = vrot.slane %v2374_v28, %v4610_v7 }
 0x17b   : > { %v1995_v19 = vrot.slane %v1973_v38, %v4610_v7  ;;  %v2004_v48 = vcombine.high %v1981_v62, %v1988_v40  ;;  %v2003_v56 = vcombine.low %v1981_v62, %v1988_v40  ;;  %v2408_v39 = vsel %vm2402_vm7, %v2389_v24, 0 }
 0x17c   : > { %v2366_v32 = vcombine.low %v2350_v25, %v2364_v41  ;;  %v2365_v18 = vcombine.low %v2343_v4, %v2357_v16  ;;  %v4235_v23 = vmov 1983009808  }
 0x17d   : > { %v2006_v54 = vcombine.high %v1995_v19, %v2002_v13  ;;  %v2005_v37 = vcombine.low %v1995_v19, %v2002_v13  ;;  %v2020_v58 = vrot.slane %v2004_v48, %v4610_v7  ;;  %v2013_v6 = vrot.slane %v2003_v56, %v4610_v7 }
 0x17e   : > { %3924 = vmatprep.mubr.msk.bf16.mxu1 %vm672_vm0, %v2366_v32  ;;  %v2714_v42 = vunpack.c.l.s4 %v4235_v23 }
 0x17f   : > { %2647 = vmatmul.mubr.bf16.gmra.mxu1 %v2365_v18  ;;  %v2034_v0 = vrot.slane %v2006_v54, %v4610_v7  ;;  %v2027_v44 = vrot.slane %v2005_v37, %v4610_v7 }
 0x180   : > { %3925 = vmatprep.mubr.msk.bf16.mxu1 %vm672_vm0, %v2408_v39  ;;  %v2715_v15 = vunpack.c.0.s8 %v2714_v42 }
 0x181   : > { %v2036_v59 = vcombine.low %v2020_v58, %v2034_v0  ;;  %v2035_v17 = vcombine.low %v2013_v6, %v2027_v44 }
 0x182   : > { %v5126_v47 = vsub.s32 %v2715_v15, %v4595_v61 }
 0x183   : > { %3919 = vmatprep.mubr.msk.bf16.mxu0 %vm672_vm0, %v2036_v59 }
 0x184   : > { %2607 = vmatmul.mubr.bf16.gmra.mxu0 %v2035_v17 }
 0x187   : > { %3926 = vmatmul.mubr.msk.bf16.gmra.mxu1 %vm2402_vm7, %v2382_v36 }
 0x19c   : > { %v2560_v45 = vpop.f32.mrf.mxu0 }
 0x19d   : > { %v2561_v43 = vadd.f32 %v5122_v46, %v2560_v45 }
 0x19e   : > { %v2562_v34 = vpop.f32.mrf.mxu0 }
 0x19f   : > { %v2662_v30 = vmax.f32 %v2561_v43, 0.0 }
 0x1a0   : > { %v2563_v7 = vpop.f32.mrf.mxu0 }
 0x1a1   : > { %v2712_v55 = vcombine.high %v2662_v30, %v2662_v30  ;;  %v2719_v52 = vrot.slane %v2662_v30, %v5126_v47  ;;  %v2564_v14 = vadd.f32 %v5122_v46, %v2563_v7 }
 0x1a2   : > { %v2565_v33 = vpop.f32.mrf.mxu0 }
 0x1a3   : > { %v2726_v8 = vrot.slane %v2712_v55, %v5126_v47  ;;  %v2727_v20 = vcombine.high %v2719_v52, %v2719_v52  ;;  %v2663_v11 = vmax.f32 %v2564_v14, 0.0 }
 0x1a5   : > { %v2728_v50 = vcombine.high %v2726_v8, %v2726_v8  ;;  %v3128_v1 = vcombine.low %v2719_v52, %v2727_v20  ;;  %v2729_v49 = vcombine.high %v2663_v11, %v2663_v11  ;;  %v2736_v61 = vrot.slane %v2663_v11, %v5126_v47 }
 0x1a7   : > { %v3129_v31 = vcombine.low %v2726_v8, %v2728_v50  ;;  %v2743_v10 = vrot.slane %v2729_v49, %v5126_v47  ;;  %v2744_v2 = vcombine.high %v2736_v61, %v2736_v61  ;;  %v3136_v35 = vrot.slane %v3128_v1, %v5126_v47 }
 0x1a9   : > { %v3143_v28 = vrot.slane %v3129_v31, %v5126_v47  ;;  %v3145_v29 = vcombine.low %v2736_v61, %v2744_v2  ;;  %v2568_v63 = vpop.f32.mrf.mxu0  ;;  %v3159_v27 = vrot.slane %v2743_v10, %v5126_v47  ;;  %v2745_v5 = vcombine.high %v2743_v10, %v2743_v10 }
 0x1aa   : > { %v2569_v57 = vadd.f32 %v5122_v46, %v2568_v63 }
 0x1ab   : > { %v3144_v21 = vcombine.low %v3136_v35, %v3143_v28  ;;  %v3152_v22 = vrot.slane %v3145_v29, %v5126_v47  ;;  %v2570_v9 = vpop.f32.mrf.mxu0 }
 0x1ac   : > { %v2664_v60 = vmax.f32 %v2569_v57, 0.0 }
 0x1ad   : > { %v3958_v3 = vpack.c.bf16 %v3144_v21, %v3144_v21  ;;  %v3160_v51 = vcombine.low %v3152_v22, %v3159_v27  ;;  %v2571_v12 = vpop.f32.mrf.mxu0 }
 0x1ae   : > { %v2746_v53 = vcombine.high %v2664_v60, %v2664_v60  ;;  %v2753_v26 = vrot.slane %v2664_v60, %v5126_v47  ;;  %v2572_v38 = vadd.f32 %v5122_v46, %v2571_v12 }
 0x1af   : > { %3730 = vst [vmem:[%s5143_s26] sm:$0xf] %v3958_v3  ;;  %v3959_v62 = vpack.c.bf16 %v3160_v51, %v3160_v51  ;;  %v2573_v40 = vpop.f32.mrf.mxu0 }
 0x1b0   : > { %v2760_v25 = vrot.slane %v2746_v53, %v5126_v47  ;;  %v2761_v41 = vcombine.high %v2753_v26, %v2753_v26  ;;  %v3161_v4 = vcombine.low %v2745_v5, %v2753_v26  ;;  %v2665_v16 = vmax.f32 %v2572_v38, 0.0 }
 0x1b1   : > { %3731 = vst [vmem:[%s5143_s26 + $0x4] sm:$0x7] %v3959_v62 }
 0x1b2   : > { %v3162_v24 = vcombine.low %v2761_v41, %v2760_v25  ;;  %v2762_v19 = vcombine.high %v2760_v25, %v2760_v25  ;;  %v2770_v13 = vrot.slane %v2665_v16, %v5126_v47  ;;  %v3169_v48 = vrot.slane %v3161_v4, %v5126_v47 }
 0x1b3   : > { %v2763_v44 = vcombine.high %v2665_v16, %v2665_v16 }
 0x1b4   : > { %v3176_v56 = vrot.slane %v3162_v24, %v5126_v47  ;;  %v2778_v32 = vcombine.high %v2770_v13, %v2770_v13  ;;  %v3178_v18 = vcombine.low %v2762_v19, %v2770_v13 }
 0x1b5   : > { %v2777_v59 = vrot.slane %v2763_v44, %v5126_v47 }
 0x1b6   : > { %v3177_v54 = vcombine.low %v3169_v48, %v3176_v56  ;;  %v3185_v37 = vrot.slane %v3178_v18, %v5126_v47  ;;  %v3192_v39 = vrot.slane %v2778_v32, %v5126_v47 }
 0x1b7   : > { %v2779_v42 = vcombine.high %v2777_v59, %v2777_v59 }
 0x1b8   : > { %v3960_v58 = vpack.c.bf16 %v3177_v54, %v3177_v54  ;;  %v3193_v0 = vcombine.low %v3185_v37, %v3192_v39 }
 0x1b9   : > { %v3194_v8 = vcombine.low %v2777_v59, %v2779_v42 }
 0x1ba   : > { %3732 = vst [vmem:[%s5143_s26 + $0x8] sm:$0xf] %v3960_v58  ;;  %v3961_v6 = vpack.c.bf16 %v3193_v0, %v3193_v0 }
 0x1bb   : > { %v3202_v21 = vrot.slane %v3194_v8, %v5126_v47 }
 0x1bc   : > { %3733 = vst [vmem:[%s5143_s26 + $0xc] sm:$0x7] %v3961_v6 }
 0x1d1   : > { %v2576_v17 = vpop.f32.mrf.mxu0 }
 0x1d2   : > { %v2577_v36 = vadd.f32 %v5122_v46, %v2576_v17 }
 0x1d3   : > { %v2578_v23 = vpop.f32.mrf.mxu0  ;;  %v2616_v45 = vpop.f32.mrf.mxu1 }
 0x1d4   : > { %v2666_v15 = vmax.f32 %v2577_v36, 0.0  ;;  %v2617_v43 = vadd.f32 %v5122_v46, %v2616_v45 }
 0x1d5   : > { %v2579_v34 = vpop.f32.mrf.mxu0  ;;  %v2618_v52 = vpop.f32.mrf.mxu1 }
 0x1d6   : > { %v2780_v30 = vcombine.high %v2666_v15, %v2666_v15  ;;  %v2787_v7 = vrot.slane %v2666_v15, %v5126_v47  ;;  %v2580_v55 = vadd.f32 %v5122_v46, %v2579_v34  ;;  %v2676_v14 = vmax.f32 %v2617_v43, 0.0 }
 0x1d7   : > { %v2581_v33 = vpop.f32.mrf.mxu0  ;;  %v2619_v1 = vpop.f32.mrf.mxu1 }
 0x1d8   : > { %v2794_v20 = vrot.slane %v2780_v30, %v5126_v47  ;;  %v2795_v11 = vcombine.high %v2787_v7, %v2787_v7  ;;  %v2667_v50 = vmax.f32 %v2580_v55, 0.0  ;;  %v2950_v49 = vcombine.high %v2676_v14, %v2676_v14 }
 0x1d9   : > { %v2957_v61 = vrot.slane %v2676_v14, %v5126_v47  ;;  %v2620_v31 = vadd.f32 %v5122_v46, %v2619_v1  ;;  %v2621_v28 = vpop.f32.mrf.mxu1 }
 0x1da   : > { %v2796_v10 = vcombine.high %v2794_v20, %v2794_v20  ;;  %v3195_v2 = vcombine.low %v2787_v7, %v2795_v11  ;;  %v5166_v35 = vrot.slane %v2667_v50, %v5126_v47  ;;  %v2964_v29 = vrot.slane %v2950_v49, %v5126_v47 }
 0x1db   : > { %v2965_v63 = vcombine.high %v2957_v61, %v2957_v61  ;;  %v2677_v57 = vmax.f32 %v2620_v31, 0.0  ;;  %v2797_v0 = vcombine.high %v2667_v50, %v2667_v50 }
 0x1dc   : > { %v3209_v22 = vrot.slane %v3195_v2, %v5126_v47  ;;  %v3211_v27 = vcombine.low %v2794_v20, %v2796_v10  ;;  %v2966_v9 = vcombine.high %v2964_v29, %v2964_v29  ;;  %v3225_v5 = vrot.slane %v5166_v35, %v5126_v47 }
 0x1dd   : > { %v3392_v60 = vcombine.low %v2957_v61, %v2965_v63  ;;  %v2967_v3 = vcombine.high %v2677_v57, %v2677_v57  ;;  %v2974_v53 = vrot.slane %v2677_v57, %v5126_v47  ;;  %v2811_v30 = vrot.slane %v2797_v0, %v5126_v47 }
 0x1de   : > { %v3210_v51 = vcombine.low %v3202_v21, %v3209_v22  ;;  %v3218_v12 = vrot.slane %v3211_v27, %v5126_v47  ;;  %v3393_v26 = vcombine.low %v2964_v29, %v2966_v9  ;;  %v2812_v7 = vcombine.high %v5166_v35, %v5166_v35 }
 0x1df   : > { %v2981_v40 = vrot.slane %v2967_v3, %v5126_v47  ;;  %v2982_v25 = vcombine.high %v2974_v53, %v2974_v53  ;;  %v3400_v41 = vrot.slane %v3392_v60, %v5126_v47  ;;  %v2813_v2 = vcombine.high %v2811_v30, %v2811_v30 }
 0x1e0   : > { %v3962_v38 = vpack.c.bf16 %v3210_v51, %v3210_v51  ;;  %v3226_v62 = vcombine.low %v3218_v12, %v3225_v5  ;;  %v3407_v4 = vrot.slane %v3393_v26, %v5126_v47  ;;  %v3227_v31 = vcombine.low %v2812_v7, %v2811_v30 }
 0x1e1   : > { %v3409_v24 = vcombine.low %v2974_v53, %v2982_v25  ;;  %v3423_v48 = vrot.slane %v2981_v40, %v5126_v47  ;;  %v2983_v44 = vcombine.high %v2981_v40, %v2981_v40 }
 0x1e2   : > { %3734 = vst [vmem:[%s5143_s26 + $0x10] sm:$0xf] %v3962_v38  ;;  %v3963_v16 = vpack.c.bf16 %v3226_v62, %v3226_v62  ;;  %v3408_v19 = vcombine.low %v3400_v41, %v3407_v4  ;;  %v3235_v12 = vrot.slane %v3227_v31, %v5126_v47 }
 0x1e3   : > { %v3416_v13 = vrot.slane %v3409_v24, %v5126_v47 }
 0x1e4   : > { %3735 = vst [vmem:[%s5143_s26 + $0x14] sm:$0x7] %v3963_v16  ;;  %v3974_v56 = vpack.c.bf16 %v3408_v19, %v3408_v19 }
 0x1e5   : > { %v3424_v32 = vcombine.low %v3416_v13, %v3423_v48 }
 0x1e6   : > { %3746 = vst [vmem:[%s5143_s26 + $0x40] sm:$0xf] %v3974_v56 }
 0x1e7   : > { %v3975_v18 = vpack.c.bf16 %v3424_v32, %v3424_v32 }
 0x1e9   : > { %v2624_v54 = vpop.f32.mrf.mxu1  ;;  %3747 = vst [vmem:[%s5143_s26 + $0x44] sm:$0x7] %v3975_v18 }
 0x1ea   : > { %v2625_v37 = vadd.f32 %v5122_v46, %v2624_v54 }
 0x1eb   : > { %v2626_v39 = vpop.f32.mrf.mxu1 }
 0x1ec   : > { %v2678_v58 = vmax.f32 %v2625_v37, 0.0 }
 0x1ed   : > { %v2627_v6 = vpop.f32.mrf.mxu1 }
 0x1ee   : > { %v2984_v59 = vcombine.high %v2678_v58, %v2678_v58  ;;  %v2991_v17 = vrot.slane %v2678_v58, %v5126_v47  ;;  %v2628_v36 = vadd.f32 %v5122_v46, %v2627_v6 }
 0x1ef   : > { %v2629_v23 = vpop.f32.mrf.mxu1 }
 0x1f0   : > { %v2998_v42 = vrot.slane %v2984_v59, %v5126_v47  ;;  %v2999_v15 = vcombine.high %v2991_v17, %v2991_v17  ;;  %v3425_v45 = vcombine.low %v2983_v44, %v2991_v17  ;;  %v2679_v43 = vmax.f32 %v2628_v36, 0.0 }
 0x1f1   : > { %v2584_v34 = vpop.f32.mrf.mxu0 }
 0x1f2   : > { %v3426_v55 = vcombine.low %v2999_v15, %v2998_v42  ;;  %v3000_v52 = vcombine.high %v2998_v42, %v2998_v42  ;;  %v3008_v14 = vrot.slane %v2679_v43, %v5126_v47  ;;  %v2585_v33 = vadd.f32 %v5122_v46, %v2584_v34 }
 0x1f3   : > { %v2586_v8 = vpop.f32.mrf.mxu0  ;;  %v3433_v20 = vrot.slane %v3425_v45, %v5126_v47  ;;  %v3001_v39 = vcombine.high %v2679_v43, %v2679_v43 }
 0x1f4   : > { %v3440_v11 = vrot.slane %v3426_v55, %v5126_v47  ;;  %v3016_v50 = vcombine.high %v3008_v14, %v3008_v14  ;;  %v3442_v1 = vcombine.low %v3000_v52, %v3008_v14  ;;  %v2668_v49 = vmax.f32 %v2585_v33, 0.0 }
 0x1f5   : > { %v2587_v61 = vpop.f32.mrf.mxu0  ;;  %v3015_v6 = vrot.slane %v3001_v39, %v5126_v47 }
 0x1f6   : > { %v3441_v10 = vcombine.low %v3433_v20, %v3440_v11  ;;  %v2588_v35 = vadd.f32 %v5122_v46, %v2587_v61  ;;  %v3449_v28 = vrot.slane %v3442_v1, %v5126_v47  ;;  %v3456_v29 = vrot.slane %v3016_v50, %v5126_v47 }
 0x1f7   : > { %v2814_v63 = vcombine.high %v2668_v49, %v2668_v49  ;;  %v2821_v57 = vrot.slane %v2668_v49, %v5126_v47  ;;  %v2589_v21 = vpop.f32.mrf.mxu0  ;;  %v3017_v42 = vcombine.high %v3015_v6, %v3015_v6 }
 0x1f8   : > { %v3976_v22 = vpack.c.bf16 %v3441_v10, %v3441_v10  ;;  %v2669_v27 = vmax.f32 %v2588_v35, 0.0  ;;  %v3457_v9 = vcombine.low %v3449_v28, %v3456_v29 }
 0x1f9   : > { %v2828_v60 = vrot.slane %v2814_v63, %v5126_v47  ;;  %v2829_v3 = vcombine.high %v2821_v57, %v2821_v57  ;;  %v3228_v51 = vcombine.low %v2813_v2, %v2821_v57  ;;  %v3458_v11 = vcombine.low %v3015_v6, %v3017_v42 }
 0x1fa   : > { %3748 = vst [vmem:[%s5143_s26 + $0x48] sm:$0xf] %v3976_v22  ;;  %v2831_v5 = vcombine.high %v2669_v27, %v2669_v27  ;;  %v2838_v53 = vrot.slane %v2669_v27, %v5126_v47  ;;  %v3977_v26 = vpack.c.bf16 %v3457_v9, %v3457_v9 }
 0x1fb   : > { %v2830_v38 = vcombine.high %v2828_v60, %v2828_v60  ;;  %v3242_v62 = vrot.slane %v3228_v51, %v5126_v47  ;;  %v3244_v40 = vcombine.low %v2829_v3, %v2828_v60  ;;  %v3466_v22 = vrot.slane %v3458_v11, %v5126_v47 }
 0x1fc   : > { %v2845_v25 = vrot.slane %v2831_v5, %v5126_v47  ;;  %v2846_v41 = vcombine.high %v2838_v53, %v2838_v53  ;;  %3749 = vst [vmem:[%s5143_s26 + $0x4c] sm:$0x7] %v3977_v26 }
 0x1fd   : > { %v3243_v4 = vcombine.low %v3235_v12, %v3242_v62  ;;  %v3251_v16 = vrot.slane %v3244_v40, %v5126_v47  ;;  %v3258_v24 = vrot.slane %v2830_v38, %v5126_v47 }
 0x1fe   : > { %v2847_v19 = vcombine.high %v2845_v25, %v2845_v25  ;;  %v3260_v13 = vcombine.low %v2838_v53, %v2846_v41 }
 0x1ff   : > { %v3259_v48 = vcombine.low %v3251_v16, %v3258_v24  ;;  %v3964_v56 = vpack.c.bf16 %v3243_v4, %v3243_v4 }
 0x200   : > { %v3261_v32 = vcombine.low %v2845_v25, %v2847_v19  ;;  %v3268_v54 = vrot.slane %v3260_v13, %v5126_v47 }
 0x201   : > { %v3965_v18 = vpack.c.bf16 %v3259_v48, %v3259_v48  ;;  %3736 = vst [vmem:[%s5143_s26 + $0x18] sm:$0xf] %v3964_v56 }
 0x202   : > { %v3275_v37 = vrot.slane %v3261_v32, %v5126_v47 }
 0x203   : > { %3737 = vst [vmem:[%s5143_s26 + $0x1c] sm:$0x7] %v3965_v18 }
 0x204   : > { %v3276_v58 = vcombine.low %v3268_v54, %v3275_v37 }
 0x206   : > { %v3966_v0 = vpack.c.bf16 %v3276_v58, %v3276_v58 }
 0x208   : > { %3738 = vst [vmem:[%s5143_s26 + $0x20] sm:$0xf] %v3966_v0 }
 0x209   : > { %v2632_v44 = vpop.f32.mrf.mxu1 }
 0x20a   : > { %v2633_v59 = vadd.f32 %v5122_v46, %v2632_v44 }
 0x20b   : > { %v2592_v17 = vpop.f32.mrf.mxu0  ;;  %v2634_v23 = vpop.f32.mrf.mxu1 }
 0x20c   : > { %v2593_v36 = vadd.f32 %v5122_v46, %v2592_v17  ;;  %v2680_v15 = vmax.f32 %v2633_v59, 0.0 }
 0x20d   : > { %v2594_v45 = vpop.f32.mrf.mxu0  ;;  %v2635_v30 = vpop.f32.mrf.mxu1 }
 0x20e   : > { %v2670_v34 = vmax.f32 %v2593_v36, 0.0  ;;  %v3018_v7 = vcombine.high %v2680_v15, %v2680_v15  ;;  %v3025_v43 = vrot.slane %v2680_v15, %v5126_v47  ;;  %v2636_v55 = vadd.f32 %v5122_v46, %v2635_v30 }
 0x20f   : > { %v2595_v52 = vpop.f32.mrf.mxu0  ;;  %v2637_v20 = vpop.f32.mrf.mxu1 }
 0x210   : > { %v2848_v14 = vcombine.high %v2670_v34, %v2670_v34  ;;  %v2855_v33 = vrot.slane %v2670_v34, %v5126_v47  ;;  %v2596_v8 = vadd.f32 %v5122_v46, %v2595_v52  ;;  %v3032_v50 = vrot.slane %v3018_v7, %v5126_v47 }
 0x211   : > { %v3033_v1 = vcombine.high %v3025_v43, %v3025_v43  ;;  %v2681_v49 = vmax.f32 %v2636_v55, 0.0  ;;  %v2597_v61 = vpop.f32.mrf.mxu0 }
 0x212   : > { %v2862_v31 = vrot.slane %v2848_v14, %v5126_v47  ;;  %v2863_v10 = vcombine.high %v2855_v33, %v2855_v33  ;;  %v2671_v2 = vmax.f32 %v2596_v8, 0.0  ;;  %v3034_v35 = vcombine.high %v3032_v50, %v3032_v50 }
 0x213   : > { %v3459_v28 = vcombine.low %v3025_v43, %v3033_v1  ;;  %v3042_v29 = vrot.slane %v2681_v49, %v5126_v47  ;;  %v3035_v32 = vcombine.high %v2681_v49, %v2681_v49 }
 0x214   : > { %v3277_v63 = vcombine.low %v2855_v33, %v2863_v10  ;;  %v2864_v57 = vcombine.high %v2862_v31, %v2862_v31  ;;  %v2865_v21 = vcombine.high %v2671_v2, %v2671_v2  ;;  %v3475_v9 = vcombine.low %v3032_v50, %v3034_v35 }
 0x215   : > { %v3473_v27 = vrot.slane %v3459_v28, %v5126_v47  ;;  %v3291_v3 = vrot.slane %v2862_v31, %v5126_v47  ;;  %v2872_v51 = vrot.slane %v2671_v2, %v5126_v47  ;;  %v3489_v26 = vrot.slane %v3042_v29, %v5126_v47 }
 0x216   : > { %v3284_v60 = vrot.slane %v3277_v63, %v5126_v47  ;;  %v5229_v12 = vrot.slane %v2865_v21, %v5126_v47  ;;  %v3482_v53 = vrot.slane %v3475_v9, %v5126_v47  ;;  %v3049_v18 = vrot.slane %v3035_v32, %v5126_v47 }
 0x217   : > { %v3474_v5 = vcombine.low %v3466_v22, %v3473_v27  ;;  %v2880_v62 = vcombine.high %v2872_v51, %v2872_v51  ;;  %v3293_v40 = vcombine.low %v2864_v57, %v2872_v51  ;;  %v3050_v54 = vcombine.high %v3042_v29, %v3042_v29 }
 0x218   : > { %v3292_v38 = vcombine.low %v3284_v60, %v3291_v3  ;;  %v3490_v41 = vcombine.low %v3482_v53, %v3489_v26  ;;  %v3051_v59 = vcombine.high %v3049_v18, %v3049_v18  ;;  %v2881_v29 = vcombine.high %v5229_v12, %v5229_v12 }
 0x219   : > { %v3978_v25 = vpack.c.bf16 %v3474_v5, %v3474_v5  ;;  %v3294_v16 = vcombine.low %v2880_v62, %v5229_v12  ;;  %v3301_v19 = vrot.slane %v3293_v40, %v5126_v47  ;;  %v3491_v6 = vcombine.low %v3050_v54, %v3049_v18 }
 0x21a   : > { %v3967_v4 = vpack.c.bf16 %v3292_v38, %v3292_v38  ;;  %v3979_v24 = vpack.c.bf16 %v3490_v41, %v3490_v41 }
 0x21b   : > { %3750 = vst [vmem:[%s5143_s26 + $0x50] sm:$0xf] %v3978_v25  ;;  %v3308_v13 = vrot.slane %v3294_v16, %v5126_v47  ;;  %v3499_v7 = vrot.slane %v3491_v6, %v5126_v47 }
 0x21c   : > { %3739 = vst [vmem:[%s5143_s26 + $0x24] sm:$0x7] %v3967_v4  ;;  %3751 = vst [vmem:[%s5143_s26 + $0x54] sm:$0x7] %v3979_v24 }
 0x21d   : > { %v3309_v48 = vcombine.low %v3301_v19, %v3308_v13 }
 0x21f   : > { %v3968_v56 = vpack.c.bf16 %v3309_v48, %v3309_v48 }
 0x221   : > { %3740 = vst [vmem:[%s5143_s26 + $0x28] sm:$0xf] %v3968_v56 }
 0x225   : > { %v2640_v37 = vpop.f32.mrf.mxu1 }
 0x226   : > { %v2641_v39 = vadd.f32 %v5122_v46, %v2640_v37 }
 0x227   : > { %v2642_v58 = vpop.f32.mrf.mxu1 }
 0x228   : > { %v2682_v0 = vmax.f32 %v2641_v39, 0.0 }
 0x229   : > { %v2643_v44 = vpop.f32.mrf.mxu1 }
 0x22a   : > { %v3052_v17 = vcombine.high %v2682_v0, %v2682_v0  ;;  %v3059_v36 = vrot.slane %v2682_v0, %v5126_v47  ;;  %v2644_v23 = vadd.f32 %v5122_v46, %v2643_v44 }
 0x22b   : > { %v2645_v42 = vpop.f32.mrf.mxu1 }
 0x22c   : > { %v3066_v15 = vrot.slane %v3052_v17, %v5126_v47  ;;  %v3067_v45 = vcombine.high %v3059_v36, %v3059_v36  ;;  %v3492_v34 = vcombine.low %v3051_v59, %v3059_v36  ;;  %v2683_v30 = vmax.f32 %v2644_v23, 0.0 }
 0x22e   : > { %v3068_v43 = vcombine.high %v3066_v15, %v3066_v15  ;;  %v3506_v55 = vrot.slane %v3492_v34, %v5126_v47  ;;  %v3508_v52 = vcombine.low %v3067_v45, %v3066_v15  ;;  %v3069_v14 = vcombine.high %v2683_v30, %v2683_v30  ;;  %v2600_v33 = vpop.f32.mrf.mxu0 }
 0x22f   : > { %v3076_v8 = vrot.slane %v2683_v30, %v5126_v47  ;;  %v2601_v20 = vadd.f32 %v5122_v46, %v2600_v33 }
 0x230   : > { %v3507_v11 = vcombine.low %v3499_v7, %v3506_v55  ;;  %v3515_v50 = vrot.slane %v3508_v52, %v5126_v47  ;;  %v3522_v1 = vrot.slane %v3068_v43, %v5126_v47  ;;  %v3083_v49 = vrot.slane %v3069_v14, %v5126_v47  ;;  %v2602_v61 = vpop.f32.mrf.mxu0 }
 0x231   : > { %v3084_v31 = vcombine.high %v3076_v8, %v3076_v8  ;;  %v2672_v10 = vmax.f32 %v2601_v20, 0.0 }
 0x232   : > { %v3523_v2 = vcombine.low %v3515_v50, %v3522_v1  ;;  %v3980_v35 = vpack.c.bf16 %v3507_v11, %v3507_v11  ;;  %v3085_v28 = vcombine.high %v3083_v49, %v3083_v49  ;;  %v2603_v63 = vpop.f32.mrf.mxu0 }
 0x233   : > { %v3524_v57 = vcombine.low %v3076_v8, %v3084_v31  ;;  %v2882_v21 = vcombine.high %v2672_v10, %v2672_v10  ;;  %v2889_v22 = vrot.slane %v2672_v10, %v5126_v47  ;;  %v2604_v27 = vadd.f32 %v5122_v46, %v2603_v63 }
 0x234   : > { %v3981_v9 = vpack.c.bf16 %v3523_v2, %v3523_v2  ;;  %3752 = vst [vmem:[%s5143_s26 + $0x58] sm:$0xf] %v3980_v35  ;;  %v3525_v60 = vcombine.low %v3083_v49, %v3085_v28  ;;  %v2605_v3 = vpop.f32.mrf.mxu0 }
 0x235   : > { %v2896_v51 = vrot.slane %v2882_v21, %v5126_v47  ;;  %v2897_v5 = vcombine.high %v2889_v22, %v2889_v22  ;;  %v3310_v53 = vcombine.low %v2881_v29, %v2889_v22  ;;  %v3532_v26 = vrot.slane %v3524_v57, %v5126_v47 }
 0x236   : > { %3753 = vst [vmem:[%s5143_s26 + $0x5c] sm:$0x7] %v3981_v9  ;;  %v3539_v12 = vrot.slane %v3525_v60, %v5126_v47  ;;  %v2673_v38 = vmax.f32 %v2604_v27, 0.0 }
 0x237   : > { %v2898_v62 = vcombine.high %v2896_v51, %v2896_v51  ;;  %v3317_v40 = vrot.slane %v3310_v53, %v5126_v47  ;;  %v3324_v25 = vrot.slane %v2897_v5, %v5126_v47 }
 0x238   : > { %v3540_v41 = vcombine.low %v3532_v26, %v3539_v12  ;;  %v2906_v4 = vrot.slane %v2673_v38, %v5126_v47  ;;  %v2899_v24 = vcombine.high %v2673_v38, %v2673_v38 }
 0x239   : > { %v3325_v16 = vcombine.low %v3317_v40, %v3324_v25  ;;  %v3326_v13 = vcombine.low %v2896_v51, %v2898_v62 }
 0x23a   : > { %v3982_v19 = vpack.c.bf16 %v3540_v41, %v3540_v41  ;;  %v2914_v48 = vcombine.high %v2906_v4, %v2906_v4  ;;  %v2913_v18 = vrot.slane %v2899_v24, %v5126_v47 }
 0x23b   : > { %v3969_v56 = vpack.c.bf16 %v3325_v16, %v3325_v16  ;;  %v3334_v54 = vrot.slane %v3326_v13, %v5126_v47 }
 0x23c   : > { %3754 = vst [vmem:[%s5143_s26 + $0x60] sm:$0xf] %v3982_v19  ;;  %v3327_v32 = vcombine.low %v2906_v4, %v2914_v48  ;;  %v2915_v0 = vcombine.high %v2913_v18, %v2913_v18 }
 0x23d   : > { %3741 = vst [vmem:[%s5143_s26 + $0x2c] sm:$0x7] %v3969_v56 }
 0x23e   : > { %v3341_v37 = vrot.slane %v3327_v32, %v5126_v47  ;;  %v3343_v23 = vcombine.low %v2913_v18, %v2915_v0 }
 0x23f   : > { %v2648_v58 = vpop.f32.mrf.mxu1 }
 0x240   : > { %v3342_v39 = vcombine.low %v3334_v54, %v3341_v37  ;;  %v2649_v6 = vadd.f32 %v5122_v46, %v2648_v58  ;;  %v3350_v1 = vrot.slane %v3343_v23, %v5126_v47 }
 0x241   : > { %v2650_v59 = vpop.f32.mrf.mxu1 }
 0x242   : > { %v3970_v44 = vpack.c.bf16 %v3342_v39, %v3342_v39  ;;  %v2684_v17 = vmax.f32 %v2649_v6, 0.0 }
 0x243   : > { %v2651_v36 = vpop.f32.mrf.mxu1 }
 0x244   : > { %3742 = vst [vmem:[%s5143_s26 + $0x30] sm:$0xf] %v3970_v44  ;;  %v3086_v42 = vcombine.high %v2684_v17, %v2684_v17  ;;  %v3093_v15 = vrot.slane %v2684_v17, %v5126_v47  ;;  %v2652_v45 = vadd.f32 %v5122_v46, %v2651_v36  ;;  %v2608_v34 = vpop.f32.mrf.mxu0 }
 0x245   : > { %v2609_v30 = vadd.f32 %v5122_v46, %v2608_v34  ;;  %v2653_v7 = vpop.f32.mrf.mxu1 }
 0x246   : > { %v3100_v43 = vrot.slane %v3086_v42, %v5126_v47  ;;  %v3101_v55 = vcombine.high %v3093_v15, %v3093_v15  ;;  %v2685_v52 = vmax.f32 %v2652_v45, 0.0  ;;  %v2610_v14 = vpop.f32.mrf.mxu0 }
 0x247   : > { %v2674_v33 = vmax.f32 %v2609_v30, 0.0  ;;  %v2656_v8 = vpop.f32.mrf.mxu1 }
 0x248   : > { %v3541_v20 = vcombine.low %v3093_v15, %v3101_v55  ;;  %v3102_v11 = vcombine.high %v3100_v43, %v3100_v43  ;;  %v3103_v50 = vcombine.high %v2685_v52, %v2685_v52  ;;  %v2611_v49 = vpop.f32.mrf.mxu0  ;;  %v3110_v61 = vrot.slane %v2685_v52, %v5126_v47 }
 0x249   : > { %v2916_v31 = vcombine.high %v2674_v33, %v2674_v33  ;;  %v2923_v10 = vrot.slane %v2674_v33, %v5126_v47  ;;  %v2657_v2 = vadd.f32 %v5122_v46, %v2656_v8  ;;  %v2658_v35 = vpop.f32.mrf.mxu1  ;;  %v3555_v29 = vrot.slane %v3100_v43, %v5126_v47 }
 0x24a   : > { %v3548_v28 = vrot.slane %v3541_v20, %v5126_v47  ;;  %v3117_v63 = vrot.slane %v3103_v50, %v5126_v47  ;;  %v2612_v57 = vadd.f32 %v5122_v46, %v2611_v49  ;;  %v2613_v21 = vpop.f32.mrf.mxu0  ;;  %v3118_v22 = vcombine.high %v3110_v61, %v3110_v61 }
 0x24b   : > { %v3557_v27 = vcombine.low %v3102_v11, %v3110_v61  ;;  %v2930_v9 = vrot.slane %v2916_v31, %v5126_v47  ;;  %v2931_v60 = vcombine.high %v2923_v10, %v2923_v10  ;;  %v2659_v3 = vpop.f32.mrf.mxu1  ;;  %v3357_v5 = vrot.slane %v2923_v10, %v5126_v47 }
 0x24c   : > { %v3556_v51 = vcombine.low %v3548_v28, %v3555_v29  ;;  %v2686_v53 = vmax.f32 %v2657_v2, 0.0  ;;  %v3119_v26 = vcombine.high %v3117_v63, %v3117_v63  ;;  %v3558_v12 = vcombine.low %v3118_v22, %v3117_v63 }
 0x24d   : > { %v3359_v38 = vcombine.low %v2931_v60, %v2930_v9  ;;  %v2675_v62 = vmax.f32 %v2612_v57, 0.0  ;;  %v2660_v40 = vpop.f32.mrf.mxu1  ;;  %v3358_v41 = vcombine.low %v3350_v1, %v3357_v5  ;;  %v2932_v4 = vcombine.high %v2930_v9, %v2930_v9 }
 0x24e   : > { %v3983_v25 = vpack.c.bf16 %v3556_v51, %v3556_v51  ;;  %v3126_v46 = vrot.slane %v2686_v53, %v5126_v47  ;;  %v3565_v16 = vrot.slane %v3557_v27, %v5126_v47  ;;  %v3572_v24 = vrot.slane %v3558_v12, %v5126_v47 }
 0x24f   : > { %v2933_v19 = vcombine.high %v2675_v62, %v2675_v62  ;;  %v2940_v13 = vrot.slane %v2675_v62, %v5126_v47  ;;  %v3971_v48 = vpack.c.bf16 %v3358_v41, %v3358_v41  ;;  %v3367_v58 = vrot.slane %v3359_v38, %v5126_v47 }
 0x250   : > { %3755 = vst [vmem:[%s5143_s26 + $0x64] sm:$0x7] %v3983_v25  ;;  %v3127_v56 = vcombine.high %v3126_v46, %v3126_v46  ;;  %v3574_v32 = vcombine.low %v3119_v26, %v3126_v46  ;;  %v3573_v18 = vcombine.low %v3565_v16, %v3572_v24 }
 0x251   : > { %v2947_v54 = vrot.slane %v2933_v19, %v5126_v47  ;;  %v2948_v37 = vcombine.high %v2940_v13, %v2940_v13  ;;  %v3360_v39 = vcombine.low %v2932_v4, %v2940_v13  ;;  %3743 = vst [vmem:[%s5143_s26 + $0x34] sm:$0x7] %v3971_v48 }
 0x252   : > { %v3581_v0 = vrot.slane %v3574_v32, %v5126_v47  ;;  %v3588_v6 = vrot.slane %v3127_v56, %v5126_v47  ;;  %v3984_v44 = vpack.c.bf16 %v3573_v18, %v3573_v18 }
 0x253   : > { %v2949_v59 = vcombine.high %v2947_v54, %v2947_v54  ;;  %v3374_v17 = vrot.slane %v3360_v39, %v5126_v47  ;;  %v3376_v36 = vcombine.low %v2948_v37, %v2947_v54 }
 0x254   : > { %v3589_v23 = vcombine.low %v3581_v0, %v3588_v6  ;;  %3756 = vst [vmem:[%s5143_s26 + $0x68] sm:$0xf] %v3984_v44 }
 0x255   : > { %v3375_v42 = vcombine.low %v3367_v58, %v3374_v17  ;;  %v3383_v15 = vrot.slane %v3376_v36, %v5126_v47  ;;  %v3390_v45 = vrot.slane %v2949_v59, %v5126_v47 }
 0x256   : > { %v3985_v34 = vpack.c.bf16 %v3589_v23, %v3589_v23 }
 0x257   : > { %v3391_v30 = vcombine.low %v3383_v15, %v3390_v45  ;;  %v3972_v7 = vpack.c.bf16 %v3375_v42, %v3375_v42 }
 0x258   : > { %3757 = vst [vmem:[%s5143_s26 + $0x6c] sm:$0x7] %v3985_v34 }
 0x259   : > { %v3973_v43 = vpack.c.bf16 %v3391_v30, %v3391_v30  ;;  %3744 = vst [vmem:[%s5143_s26 + $0x38] sm:$0xf] %v3972_v7 }
 0x25b   : > { %3745 = vst [vmem:[%s5143_s26 + $0x3c] sm:$0x7] %v3973_v43 }
 0x25c PF: > { %s17_s17 = sadd.s32 1, %s4220_s17   ;;  %s5329_s12 = smov %s4204_s13 }
 0x25d   : > { %p14_p4 = scmp.ge.s32.totalorder %s17_s17, 4   ;;  %s5330_s13 = smov %s4208_s14 }
 0x25e   : > { %s5331_s14 = smov %s4333_s9  ;;  %s5332_s15 = smov %s4216_s16 }
 0x25f   : > { %s5333_s16 = smov %s5335_s25  ;;  %16 = sbr.rel (!%p14_p4) target bundleno = 5 (0x5), region = 77 }
 0x264   :  { %3790 = vsyncpa [#allocation3], 1 }
 0x265   :  { %3792 = vsyncpa [#allocation3 + $0x1], 1 }
 0x266   :  { %3793 = vsyncpa [#allocation5], 1 }

</bundles_post_ra>
